<compile_context>
chip_gen: v7x
topology: tpu7x:2x2x1
jax: 0.10.0
libtpu: 0.0.40
codegen_flags: <defaults>
</compile_context>

<pallas_src>
import functools
import math

import jax
import jax.numpy as jnp
from jax.experimental import pallas as pl
from jax.experimental.pallas import tpu as pltpu


# ---------------------------------------------------------------------------
# in-kernel helpers
# ---------------------------------------------------------------------------

def _masked_layernorm(x, g, b, h_real, eps=1e-12):
    """LayerNorm over the first `h_real` lanes of the (lane-padded) last dim."""
    hp = x.shape[-1]
    if h_real == hp:
        mu = jnp.mean(x, axis=-1, keepdims=True)
        var = jnp.mean((x - mu) ** 2, axis=-1, keepdims=True)
    else:
        lane = jax.lax.broadcasted_iota(jnp.int32, x.shape, x.ndim - 1)
        m = (lane < h_real).astype(jnp.float32)
        inv = 1.0 / float(h_real)
        mu = jnp.sum(x * m, axis=-1, keepdims=True) * inv
        var = jnp.sum(((x - mu) * m) ** 2, axis=-1, keepdims=True) * inv
    # padded lanes of g/b are zero -> padded output lanes stay exactly zero
    return (x - mu) * jax.lax.rsqrt(var + eps) * g + b


def _softmax_last(x):
    m = jnp.max(x, axis=-1, keepdims=True)
    e = jnp.exp(x - m)
    return e / jnp.sum(e, axis=-1, keepdims=True)


# ---------------------------------------------------------------------------
# Kernel 1: fused transformer encoder layer (embedding-LN -> attn -> FFN)
# Processes both the `text` and `ext` sequences (stacked on the leading axis)
# with a grid over that axis; weights stay VMEM-resident via constant index maps.
# ---------------------------------------------------------------------------

def _encoder_kernel(emb_ref, mask_ref,
                    ln_emb_g_ref, ln_emb_b_ref,
                    wqkv_ref, bqkv_ref, wo_ref, bo_ref,
                    ln1_g_ref, ln1_b_ref,
                    w1_ref, b1_ref, w2_ref, b2_ref,
                    ln2_g_ref, ln2_b_ref,
                    out_ref, *, h_real, scale):
    _, b, s, hp = emb_ref.shape
    rows = b * s

    emb = emb_ref[...].reshape(rows, hp)
    msk = mask_ref[...].reshape(b, s)

    # embedding layernorm
    h0 = _masked_layernorm(emb, ln_emb_g_ref[...], ln_emb_b_ref[...], h_real)

    # fused QKV projection: one (rows, hp) x (hp, 3hp) matmul
    qkv = jnp.dot(h0, wqkv_ref[...], preferred_element_type=jnp.float32) + bqkv_ref[...]
    q = qkv[:, :hp].reshape(b, s, hp)
    k = qkv[:, hp:2 * hp].reshape(b, s, hp)
    v = qkv[:, 2 * hp:].reshape(b, s, hp)

    # masked scaled-dot-product attention (padded lanes contribute zero)
    scores = jnp.einsum("bqd,bkd->bqk", q, k,
                        preferred_element_type=jnp.float32) * scale
    scores = scores + (1.0 - msk)[:, None, :] * (-1e9)
    smax = jnp.max(scores, axis=-1, keepdims=True)
    p = jnp.exp(scores - smax)
    p = p / jnp.sum(p, axis=-1, keepdims=True)
    ctx = jnp.einsum("bqk,bkd->bqd", p, v,
                     preferred_element_type=jnp.float32).reshape(rows, hp)

    attn = jnp.dot(ctx, wo_ref[...], preferred_element_type=jnp.float32) + bo_ref[...]
    # fused residual + layernorm
    h1 = _masked_layernorm(h0 + attn, ln1_g_ref[...], ln1_b_ref[...], h_real)

    # FFN (GELU)
    ff = jnp.dot(h1, w1_ref[...], preferred_element_type=jnp.float32) + b1_ref[...]
    ff = jax.nn.gelu(ff, approximate=True)
    ff = jnp.dot(ff, w2_ref[...], preferred_element_type=jnp.float32) + b2_ref[...]
    h2 = _masked_layernorm(h1 + ff, ln2_g_ref[...], ln2_b_ref[...], h_real)

    out_ref[...] = h2.reshape(1, b, s, hp)


# ---------------------------------------------------------------------------
# Kernel 2: multimodal fusion (cross-attn + mean pool) + all three heads
#   gt_target     = st_gumbel_softmax(softmax(fc_gt(ext_cls)), temp)
#   align_target  = softmax(fc_a(align_repre))
#   score         = sigmoid(scorer(cat(align_repre, text_cls)))
# ---------------------------------------------------------------------------

def _fusion_heads_kernel(v_ref, text_ref, ext_cls_ref, u_ref,
                         wv_lin_ref, bv_lin_ref,
                         wq_f_ref, bq_f_ref, wkv_f_ref, bkv_f_ref,
                         wo_f_ref, bo_f_ref,
                         w_gt_ref, b_gt_ref, w_a_ref, b_a_ref,
                         w_s_ref, b_s_ref,
                         score_ref, gt_ref, align_ref, *, scale, temp):
    b, r, vd = v_ref.shape
    s = text_ref.shape[1]
    hp = text_ref.shape[2]

    # visual projection v_dim -> hp
    v_h = jnp.dot(v_ref[...].reshape(b * r, vd), wv_lin_ref[...],
                  preferred_element_type=jnp.float32) + bv_lin_ref[...]

    # queries from visual regions
    q = (jnp.dot(v_h, wq_f_ref[...], preferred_element_type=jnp.float32)
         + bq_f_ref[...]).reshape(b, r, hp)

    # fused K|V projection from text
    text = text_ref[...]
    kv = jnp.dot(text.reshape(b * s, hp), wkv_f_ref[...],
                 preferred_element_type=jnp.float32) + bkv_f_ref[...]
    k = kv[:, :hp].reshape(b, s, hp)
    val = kv[:, hp:].reshape(b, s, hp)

    scores = jnp.einsum("bqd,bkd->bqk", q, k,
                        preferred_element_type=jnp.float32) * scale
    p = _softmax_last(scores)
    ctx = jnp.einsum("bqk,bkd->bqd", p, val,
                     preferred_element_type=jnp.float32).reshape(b * r, hp)
    fused = jnp.dot(ctx, wo_f_ref[...], preferred_element_type=jnp.float32) + bo_f_ref[...]
    align_repre = jnp.mean(fused.reshape(b, r, hp), axis=1)        # (b, hp)

    # --- gt head: fc_gt -> softmax -> straight-through gumbel-softmax ---
    ext_cls = ext_cls_ref[...]
    gt_logits = jnp.dot(ext_cls, w_gt_ref[...],
                        preferred_element_type=jnp.float32) + b_gt_ref[...]
    gt_probs = _softmax_last(gt_logits)
    eps = 1e-20
    u = u_ref[...]
    gumbel = -jnp.log(-jnp.log(u + eps) + eps)
    y = _softmax_last((gt_probs + gumbel) / temp)   # matches reference (probs + noise)
    c = y.shape[-1]
    col = jax.lax.broadcasted_iota(jnp.int32, y.shape, 1)
    rmax = jnp.max(y, axis=-1, keepdims=True)
    first_idx = jnp.min(jnp.where(y == rmax, col, c), axis=-1, keepdims=True)
    y_hard = (col == first_idx).astype(jnp.float32)
    # TODO(synk): straight-through gradient ((y_hard - y).detach() + y) is forward-only here.
    gt_ref[...] = (y_hard - y) + y

    # --- align head: fc_a -> softmax ---
    a_logits = jnp.dot(align_repre, w_a_ref[...],
                       preferred_element_type=jnp.float32) + b_a_ref[...]
    align_ref[...] = _softmax_last(a_logits)

    # --- scorer: sigmoid(W_s @ cat(align_repre, text_cls)) without a concat ---
    text_cls = text[:, 0, :]                                       # (b, hp)
    w_s = w_s_ref[...]                                             # (2hp, 1)
    sc = (jnp.dot(align_repre, w_s[:hp, :], preferred_element_type=jnp.float32)
          + jnp.dot(text_cls, w_s[hp:, :], preferred_element_type=jnp.float32)
          + b_s_ref[...])
    score_ref[...] = jax.nn.sigmoid(sc)


# ---------------------------------------------------------------------------
# Synthetic Latent_Bert built on the two fused Pallas kernels
# ---------------------------------------------------------------------------

class LatentBertPallas:
    def __init__(self, key, *, vocab=64, hidden=32, seq=8, v_dim=16, regions=4,
                 n_classes=4, temp=1.0, lane_pad=128):
        self.H = hidden
        self.HP = ((hidden + lane_pad - 1) // lane_pad) * lane_pad   # lane-padded hidden
        self.S = seq
        self.v_dim = v_dim
        self.R = regions
        self.C = n_classes
        self.temp = temp
        self.F = 4 * hidden                                          # FFN intermediate

        H, HP, F = hidden, self.HP, self.F

        def nrm(k, shape):
            return jax.random.normal(k, shape, jnp.float32) * 0.02

        def padc(w, cols):      # zero-pad columns (lanes)
            return jnp.zeros((w.shape[0], cols), jnp.float32).at[:, :w.shape[1]].set(w)

        def padrc(w, rows, cols):
            return jnp.zeros((rows, cols), jnp.float32).at[:w.shape[0], :w.shape[1]].set(w)

        def ln_params():
            g = jnp.zeros((1, HP), jnp.float32).at[:, :H].set(1.0)
            return g, jnp.zeros((1, HP), jnp.float32)

        ks = jax.random.split(key, 24)
        # embeddings (lane-padded)
        self.tok_emb = padc(nrm(ks[0], (vocab, H)), HP)
        self.pos_emb = padc(nrm(ks[1], (seq, H)), HP)
        self.type_emb = padc(nrm(ks[2], (2, H)), HP)
        self.ln_emb_g, self.ln_emb_b = ln_params()
        self.ln1_g, self.ln1_b = ln_params()
        self.ln2_g, self.ln2_b = ln_params()
        # encoder attention: fused QKV
        Wq = padrc(nrm(ks[3], (H, H)), HP, HP)
        Wk = padrc(nrm(ks[4], (H, H)), HP, HP)
        Wv = padrc(nrm(ks[5], (H, H)), HP, HP)
        self.Wqkv = jnp.concatenate([Wq, Wk, Wv], axis=1)            # (HP, 3HP)
        self.bqkv = jnp.zeros((1, 3 * HP), jnp.float32)
        self.Wo = padrc(nrm(ks[6], (H, H)), HP, HP)
        self.bo = jnp.zeros((1, HP), jnp.float32)
        # FFN
        self.W1 = padrc(nrm(ks[7], (H, F)), HP, F)
        self.b1 = jnp.zeros((1, F), jnp.float32)
        self.W2 = padrc(nrm(ks[8], (F, H)), F, HP)
        self.b2 = jnp.zeros((1, HP), jnp.float32)
        # multimodal fusion (cross-attention) with fused K|V
        self.Wq_f = padrc(nrm(ks[9], (H, H)), HP, HP)
        self.bq_f = jnp.zeros((1, HP), jnp.float32)
        Wk_f = padrc(nrm(ks[10], (H, H)), HP, HP)
        Wv_f = padrc(nrm(ks[11], (H, H)), HP, HP)
        self.Wkv_f = jnp.concatenate([Wk_f, Wv_f], axis=1)           # (HP, 2HP)
        self.bkv_f = jnp.zeros((1, 2 * HP), jnp.float32)
        self.Wo_f = padrc(nrm(ks[12], (H, H)), HP, HP)
        self.bo_f = jnp.zeros((1, HP), jnp.float32)
        # self.linear : v_dim -> H
        self.Wv_lin = padc(nrm(ks[13], (v_dim, H)), HP)
        self.bv_lin = jnp.zeros((1, HP), jnp.float32)
        # fc_gt, fc_a : H -> n_classes
        self.W_gt = padrc(nrm(ks[14], (H, n_classes)), HP, n_classes)
        self.b_gt = jnp.zeros((1, n_classes), jnp.float32)
        self.W_a = padrc(nrm(ks[15], (H, n_classes)), HP, n_classes)
        self.b_a = jnp.zeros((1, n_classes), jnp.float32)
        # scorer : 2H -> 1   (laid out to match cat([align_repre_pad, text_cls_pad]))
        Ws = nrm(ks[16], (2 * H, 1))
        W_s = jnp.zeros((2 * HP, 1), jnp.float32)
        W_s = W_s.at[:H, :].set(Ws[:H]).at[HP:HP + H, :].set(Ws[H:])
        self.W_s = W_s
        self.b_s = jnp.zeros((1, 1), jnp.float32)

    # --- embedding lookup (JAX glue: gathers only) ---
    def _embed(self, ids, token_type_ids):
        emb = jnp.take(self.tok_emb, ids, axis=0) + self.pos_emb[None, :, :]
        if token_type_ids is not None:
            emb = emb + jnp.take(self.type_emb, token_type_ids, axis=0)
        return emb                                                   # (B, S, HP)

    # --- single fused encoder pass over the stacked (text, ext) batch ---
    def run_encoder(self, emb_all, mask_all):
        two, B, S, HP = emb_all.shape
        weights = [self.ln_emb_g, self.ln_emb_b,
                   self.Wqkv, self.bqkv, self.Wo, self.bo,
                   self.ln1_g, self.ln1_b,
                   self.W1, self.b1, self.W2, self.b2,
                   self.ln2_g, self.ln2_b]

        def wspec(w):
            return pl.BlockSpec(w.shape, lambda i, _n=w.ndim: (0,) * _n)

        in_specs = ([pl.BlockSpec((1, B, S, HP), lambda i: (i, 0, 0, 0)),
                     pl.BlockSpec((1, B, S), lambda i: (i, 0, 0))]
                    + [wspec(w) for w in weights])
        out_specs = pl.BlockSpec((1, B, S, HP), lambda i: (i, 0, 0, 0))

        kern = functools.partial(_encoder_kernel, h_real=self.H,
                                 scale=1.0 / math.sqrt(self.H))
        return pl.pallas_call(
            kern,
            out_shape=jax.ShapeDtypeStruct((two, B, S, HP), jnp.float32),
            grid=(two,),
            in_specs=in_specs,
            out_specs=out_specs,
            compiler_params=pltpu.CompilerParams(
                dimension_semantics=("parallel",)),
        )(emb_all, mask_all, *weights)

    # --- fused multimodal-fusion + heads pass ---
    def run_fusion_heads(self, v, text_repre, ext_cls, gumbel_u):
        B = v.shape[0]
        C = self.C
        weights = [self.Wv_lin, self.bv_lin,
                   self.Wq_f, self.bq_f, self.Wkv_f, self.bkv_f,
                   self.Wo_f, self.bo_f,
                   self.W_gt, self.b_gt, self.W_a, self.b_a,
                   self.W_s, self.b_s]

        def vm():
            return pl.BlockSpec(memory_space=pltpu.MemorySpace.VMEM)

        kern = functools.partial(_fusion_heads_kernel,
                                 scale=1.0 / math.sqrt(self.H), temp=self.temp)
        return pl.pallas_call(
            kern,
            out_shape=(jax.ShapeDtypeStruct((B, 1), jnp.float32),
                       jax.ShapeDtypeStruct((B, C), jnp.float32),
                       jax.ShapeDtypeStruct((B, C), jnp.float32)),
            in_specs=[vm() for _ in range(4 + len(weights))],
            out_specs=(vm(), vm(), vm()),
        )(v, text_repre, ext_cls, gumbel_u, *weights)

    # --- Latent_Bert.forward ---
    def forward(self, v, text, ext, token_type_ids, mask, ext_mask, gumbel_u):
        # batch text + ext into ONE encoder pass (stacked leading axis of 2)
        emb_text = self._embed(text, token_type_ids)
        emb_ext = self._embed(ext, None)
        emb_all = jnp.stack([emb_text, emb_ext], axis=0)             # (2, B, S, HP)
        mask_all = jnp.stack([mask, ext_mask], axis=0)               # (2, B, S)

        hidden = self.run_encoder(emb_all, mask_all)                 # (2, B, S, HP)
        text_repre = hidden[0]                                       # bert_out[1][-1]
        ext_repre = hidden[1][:, 0, :]                               # ext [CLS]

        score, gt_target, align_target = self.run_fusion_heads(
            v, text_repre, ext_repre, gumbel_u)
        return score, gt_target, align_target


# ---------------------------------------------------------------------------
# Demo
# ---------------------------------------------------------------------------

if __name__ == "__main__":
    B, S, H, V_DIM, R, C, VOCAB = 2, 8, 32, 16, 4, 4, 64

    key = jax.random.PRNGKey(0)
    k_param, k_v, k_text, k_ext, k_type, k_u = jax.random.split(key, 6)

    model = LatentBertPallas(k_param, vocab=VOCAB, hidden=H, seq=S, v_dim=V_DIM,
                             regions=R, n_classes=C, temp=1.0)

    v = jax.random.normal(k_v, (B, R, V_DIM), jnp.float32)
    text = jax.random.randint(k_text, (B, S), 0, VOCAB, jnp.int32)
    ext = jax.random.randint(k_ext, (B, S), 0, VOCAB, jnp.int32)
    token_type_ids = jax.random.randint(k_type, (B, S), 0, 2, jnp.int32)
    mask = jnp.ones((B, S), jnp.float32)
    ext_mask = jnp.ones((B, S), jnp.float32)
    # u = logits.data.new(*logits.size()).uniform_()  -> deterministic jax.random equivalent
    gumbel_u = jax.random.uniform(k_u, (B, C), jnp.float32)

    fwd = jax.jit(model.forward)
    score, gt_target, align_target = fwd(v, text, ext, token_type_ids,
                                         mask, ext_mask, gumbel_u)
    jax.block_until_ready((score, gt_target, align_target))

    assert score.shape == (B, 1)
    assert gt_target.shape == (B, C)
    assert align_target.shape == (B, C)
    assert bool(jnp.all(jnp.isfinite(score)))
    assert bool(jnp.all(jnp.isfinite(gt_target)))
    assert bool(jnp.all(jnp.isfinite(align_target)))
    print("KERNEL_OK")
</pallas_src>

<mosaic_0001>
module attributes {stable_mosaic.version = 11 : i64} {
  func.func @_fusion_heads_kernel(%arg0: memref<2x4x16xf32, #tpu.memory_space<vmem>>, %arg1: memref<2x8x128xf32, #tpu.memory_space<vmem>>, %arg2: memref<2x128xf32, #tpu.memory_space<vmem>>, %arg3: memref<2x4xf32, #tpu.memory_space<vmem>>, %arg4: memref<16x128xf32, #tpu.memory_space<vmem>>, %arg5: memref<1x128xf32, #tpu.memory_space<vmem>>, %arg6: memref<128x128xf32, #tpu.memory_space<vmem>>, %arg7: memref<1x128xf32, #tpu.memory_space<vmem>>, %arg8: memref<128x256xf32, #tpu.memory_space<vmem>>, %arg9: memref<1x256xf32, #tpu.memory_space<vmem>>, %arg10: memref<128x128xf32, #tpu.memory_space<vmem>>, %arg11: memref<1x128xf32, #tpu.memory_space<vmem>>, %arg12: memref<128x4xf32, #tpu.memory_space<vmem>>, %arg13: memref<1x4xf32, #tpu.memory_space<vmem>>, %arg14: memref<128x4xf32, #tpu.memory_space<vmem>>, %arg15: memref<1x4xf32, #tpu.memory_space<vmem>>, %arg16: memref<256x1xf32, #tpu.memory_space<vmem>>, %arg17: memref<1x1xf32, #tpu.memory_space<vmem>>, %arg18: memref<2x1xf32, #tpu.memory_space<vmem>>, %arg19: memref<2x4xf32, #tpu.memory_space<vmem>>, %arg20: memref<2x4xf32, #tpu.memory_space<vmem>>) attributes {dimension_semantics = [], scalar_prefetch = 0 : i64, scratch_operands = 0 : i64, tpu.core_type = #tpu.core_type<tc>} {
    %c0 = arith.constant 0 : index
    %c0_0 = arith.constant 0 : index
    %c0_1 = arith.constant 0 : index
    %0 = vector.load %arg0[%c0, %c0_0, %c0_1] : memref<2x4x16xf32, #tpu.memory_space<vmem>>, vector<2x4x16xf32>
    %1 = vector.shape_cast %0 : vector<2x4x16xf32> to vector<8x16xf32>
    %c0_2 = arith.constant 0 : index
    %c0_3 = arith.constant 0 : index
    %2 = vector.load %arg4[%c0_2, %c0_3] : memref<16x128xf32, #tpu.memory_space<vmem>>, vector<16x128xf32>
    %cst = arith.constant dense<0.000000e+00> : vector<8x128xf32>
    %3 = tpu.matmul %1, %2, %cst {dimension_numbers = #tpu.dot_dimension_numbers<[1], [0], [0], [1], [0, 0, 1, 1], [], []>} : vector<8x16xf32>, vector<16x128xf32>, vector<8x128xf32> -> vector<8x128xf32>
    %c0_4 = arith.constant 0 : index
    %c0_5 = arith.constant 0 : index
    %4 = vector.load %arg5[%c0_4, %c0_5] : memref<1x128xf32, #tpu.memory_space<vmem>>, vector<1x128xf32>
    %5 = vector.broadcast %4 : vector<1x128xf32> to vector<8x128xf32>
    %6 = arith.addf %3, %5 : vector<8x128xf32>
    %c0_6 = arith.constant 0 : index
    %c0_7 = arith.constant 0 : index
    %7 = vector.load %arg6[%c0_6, %c0_7] : memref<128x128xf32, #tpu.memory_space<vmem>>, vector<128x128xf32>
    %cst_8 = arith.constant dense<0.000000e+00> : vector<8x128xf32>
    %8 = tpu.matmul %6, %7, %cst_8 {dimension_numbers = #tpu.dot_dimension_numbers<[1], [0], [0], [1], [0, 0, 1, 1], [], []>} : vector<8x128xf32>, vector<128x128xf32>, vector<8x128xf32> -> vector<8x128xf32>
    %c0_9 = arith.constant 0 : index
    %c0_10 = arith.constant 0 : index
    %9 = vector.load %arg7[%c0_9, %c0_10] : memref<1x128xf32, #tpu.memory_space<vmem>>, vector<1x128xf32>
    %10 = vector.broadcast %9 : vector<1x128xf32> to vector<8x128xf32>
    %11 = arith.addf %8, %10 : vector<8x128xf32>
    %12 = vector.shape_cast %11 : vector<8x128xf32> to vector<2x4x128xf32>
    %c0_11 = arith.constant 0 : index
    %c0_12 = arith.constant 0 : index
    %c0_13 = arith.constant 0 : index
    %13 = vector.load %arg1[%c0_11, %c0_12, %c0_13] : memref<2x8x128xf32, #tpu.memory_space<vmem>>, vector<2x8x128xf32>
    %14 = vector.shape_cast %13 : vector<2x8x128xf32> to vector<16x128xf32>
    %c0_14 = arith.constant 0 : index
    %c0_15 = arith.constant 0 : index
    %15 = vector.load %arg8[%c0_14, %c0_15] : memref<128x256xf32, #tpu.memory_space<vmem>>, vector<128x256xf32>
    %cst_16 = arith.constant dense<0.000000e+00> : vector<16x256xf32>
    %16 = tpu.matmul %14, %15, %cst_16 {dimension_numbers = #tpu.dot_dimension_numbers<[1], [0], [0], [1], [0, 0, 1, 1], [], []>} : vector<16x128xf32>, vector<128x256xf32>, vector<16x256xf32> -> vector<16x256xf32>
    %c0_17 = arith.constant 0 : index
    %c0_18 = arith.constant 0 : index
    %17 = vector.load %arg9[%c0_17, %c0_18] : memref<1x256xf32, #tpu.memory_space<vmem>>, vector<1x256xf32>
    %18 = vector.broadcast %17 : vector<1x256xf32> to vector<16x256xf32>
    %19 = arith.addf %16, %18 : vector<16x256xf32>
    %20 = vector.extract_strided_slice %19 {offsets = [0, 0], sizes = [16, 128], strides = [1, 1]} : vector<16x256xf32> to vector<16x128xf32>
    %21 = vector.shape_cast %20 : vector<16x128xf32> to vector<2x8x128xf32>
    %22 = vector.extract_strided_slice %19 {offsets = [0, 128], sizes = [16, 128], strides = [1, 1]} : vector<16x256xf32> to vector<16x128xf32>
    %23 = vector.shape_cast %22 : vector<16x128xf32> to vector<2x8x128xf32>
    "tpu.trace_start"() <{level = 10 : i32, message = "bqd,bkd->bqk"}> : () -> ()
    %cst_19 = arith.constant dense<0.000000e+00> : vector<2x4x8xf32>
    %24 = tpu.matmul %12, %21, %cst_19 {dimension_numbers = #tpu.dot_dimension_numbers<[2], [2], [1], [1], [0, 0, 0, 1, 1, 1], [0], [0]>} : vector<2x4x128xf32>, vector<2x8x128xf32>, vector<2x4x8xf32> -> vector<2x4x8xf32>
    "tpu.trace_stop"() : () -> ()
    %cst_20 = arith.constant 0.176776692 : f32
    %25 = vector.broadcast %cst_20 : f32 to vector<2x4x8xf32>
    %26 = arith.mulf %24, %25 : vector<2x4x8xf32>
    %cst_21 = arith.constant dense<0xFF800000> : vector<2x4xf32>
    %27 = vector.multi_reduction <maximumf>, %26, %cst_21 [2] : vector<2x4x8xf32> to vector<2x4xf32>
    %28 = vector.shape_cast %27 : vector<2x4xf32> to vector<2x4x1xf32>
    %29 = vector.broadcast %28 : vector<2x4x1xf32> to vector<2x4x8xf32>
    %30 = arith.subf %26, %29 : vector<2x4x8xf32>
    %31 = math.exp %30 : vector<2x4x8xf32>
    %cst_22 = arith.constant dense<0.000000e+00> : vector<2x4xf32>
    %32 = vector.multi_reduction <add>, %31, %cst_22 [2] : vector<2x4x8xf32> to vector<2x4xf32>
    %33 = vector.shape_cast %32 : vector<2x4xf32> to vector<2x4x1xf32>
    %34 = vector.broadcast %33 : vector<2x4x1xf32> to vector<2x4x8xf32>
    %35 = arith.divf %31, %34 : vector<2x4x8xf32>
    "tpu.trace_start"() <{level = 10 : i32, message = "bqk,bkd->bqd"}> : () -> ()
    %cst_23 = arith.constant dense<0.000000e+00> : vector<2x4x128xf32>
    %36 = tpu.matmul %35, %23, %cst_23 {dimension_numbers = #tpu.dot_dimension_numbers<[2], [1], [1], [2], [0, 0, 0, 1, 1, 2], [0], [0]>} : vector<2x4x8xf32>, vector<2x8x128xf32>, vector<2x4x128xf32> -> vector<2x4x128xf32>
    "tpu.trace_stop"() : () -> ()
    %37 = vector.shape_cast %36 : vector<2x4x128xf32> to vector<8x128xf32>
    %c0_24 = arith.constant 0 : index
    %c0_25 = arith.constant 0 : index
    %38 = vector.load %arg10[%c0_24, %c0_25] : memref<128x128xf32, #tpu.memory_space<vmem>>, vector<128x128xf32>
    %cst_26 = arith.constant dense<0.000000e+00> : vector<8x128xf32>
    %39 = tpu.matmul %37, %38, %cst_26 {dimension_numbers = #tpu.dot_dimension_numbers<[1], [0], [0], [1], [0, 0, 1, 1], [], []>} : vector<8x128xf32>, vector<128x128xf32>, vector<8x128xf32> -> vector<8x128xf32>
    %c0_27 = arith.constant 0 : index
    %c0_28 = arith.constant 0 : index
    %40 = vector.load %arg11[%c0_27, %c0_28] : memref<1x128xf32, #tpu.memory_space<vmem>>, vector<1x128xf32>
    %41 = vector.broadcast %40 : vector<1x128xf32> to vector<8x128xf32>
    %42 = arith.addf %39, %41 : vector<8x128xf32>
    %43 = vector.shape_cast %42 : vector<8x128xf32> to vector<2x4x128xf32>
    %cst_29 = arith.constant dense<0.000000e+00> : vector<2x128xf32>
    %44 = vector.multi_reduction <add>, %43, %cst_29 [1] : vector<2x4x128xf32> to vector<2x128xf32>
    %cst_30 = arith.constant 4.000000e+00 : f32
    %45 = vector.broadcast %cst_30 : f32 to vector<2x128xf32>
    %46 = arith.divf %44, %45 : vector<2x128xf32>
    %c0_31 = arith.constant 0 : index
    %c0_32 = arith.constant 0 : index
    %47 = vector.load %arg2[%c0_31, %c0_32] : memref<2x128xf32, #tpu.memory_space<vmem>>, vector<2x128xf32>
    %c0_33 = arith.constant 0 : index
    %c0_34 = arith.constant 0 : index
    %48 = vector.load %arg12[%c0_33, %c0_34] : memref<128x4xf32, #tpu.memory_space<vmem>>, vector<128x4xf32>
    %cst_35 = arith.constant dense<0.000000e+00> : vector<2x4xf32>
    %49 = tpu.matmul %47, %48, %cst_35 {dimension_numbers = #tpu.dot_dimension_numbers<[1], [0], [0], [1], [0, 0, 1, 1], [], []>} : vector<2x128xf32>, vector<128x4xf32>, vector<2x4xf32> -> vector<2x4xf32>
    %c0_36 = arith.constant 0 : index
    %c0_37 = arith.constant 0 : index
    %50 = vector.load %arg13[%c0_36, %c0_37] : memref<1x4xf32, #tpu.memory_space<vmem>>, vector<1x4xf32>
    %51 = vector.broadcast %50 : vector<1x4xf32> to vector<2x4xf32>
    %52 = arith.addf %49, %51 : vector<2x4xf32>
    %cst_38 = arith.constant dense<0xFF800000> : vector<2xf32>
    %53 = vector.multi_reduction <maximumf>, %52, %cst_38 [1] : vector<2x4xf32> to vector<2xf32>
    %54 = vector.shape_cast %53 : vector<2xf32> to vector<2x1xf32>
    %55 = vector.broadcast %54 : vector<2x1xf32> to vector<2x4xf32>
    %56 = arith.subf %52, %55 : vector<2x4xf32>
    %57 = math.exp %56 : vector<2x4xf32>
    %cst_39 = arith.constant dense<0.000000e+00> : vector<2xf32>
    %58 = vector.multi_reduction <add>, %57, %cst_39 [1] : vector<2x4xf32> to vector<2xf32>
    %59 = vector.shape_cast %58 : vector<2xf32> to vector<2x1xf32>
    %60 = vector.broadcast %59 : vector<2x1xf32> to vector<2x4xf32>
    %61 = arith.divf %57, %60 : vector<2x4xf32>
    %c0_40 = arith.constant 0 : index
    %c0_41 = arith.constant 0 : index
    %62 = vector.load %arg3[%c0_40, %c0_41] : memref<2x4xf32, #tpu.memory_space<vmem>>, vector<2x4xf32>
    %cst_42 = arith.constant 9.99999968E-21 : f32
    %63 = vector.broadcast %cst_42 : f32 to vector<2x4xf32>
    %64 = arith.addf %62, %63 : vector<2x4xf32>
    %65 = math.log %64 : vector<2x4xf32>
    %cst_43 = arith.constant 0.000000e+00 : f32
    %66 = vector.broadcast %cst_43 : f32 to vector<2x4xf32>
    %67 = arith.subf %66, %65 : vector<2x4xf32>
    %cst_44 = arith.constant 9.99999968E-21 : f32
    %68 = vector.broadcast %cst_44 : f32 to vector<2x4xf32>
    %69 = arith.addf %67, %68 : vector<2x4xf32>
    %70 = math.log %69 : vector<2x4xf32>
    %cst_45 = arith.constant 0.000000e+00 : f32
    %71 = vector.broadcast %cst_45 : f32 to vector<2x4xf32>
    %72 = arith.subf %71, %70 : vector<2x4xf32>
    %73 = arith.addf %61, %72 : vector<2x4xf32>
    %cst_46 = arith.constant 1.000000e+00 : f32
    %74 = vector.broadcast %cst_46 : f32 to vector<2x4xf32>
    %75 = arith.divf %73, %74 : vector<2x4xf32>
    %cst_47 = arith.constant dense<0xFF800000> : vector<2xf32>
    %76 = vector.multi_reduction <maximumf>, %75, %cst_47 [1] : vector<2x4xf32> to vector<2xf32>
    %77 = vector.shape_cast %76 : vector<2xf32> to vector<2x1xf32>
    %78 = vector.broadcast %77 : vector<2x1xf32> to vector<2x4xf32>
    %79 = arith.subf %75, %78 : vector<2x4xf32>
    %80 = math.exp %79 : vector<2x4xf32>
    %cst_48 = arith.constant dense<0.000000e+00> : vector<2xf32>
    %81 = vector.multi_reduction <add>, %80, %cst_48 [1] : vector<2x4xf32> to vector<2xf32>
    %82 = vector.shape_cast %81 : vector<2xf32> to vector<2x1xf32>
    %83 = vector.broadcast %82 : vector<2x1xf32> to vector<2x4xf32>
    %84 = arith.divf %80, %83 : vector<2x4xf32>
    %85 = tpu.iota {dimensions = array<i32: 1>} : vector<2x4xi32>
    %cst_49 = arith.constant dense<0xFF800000> : vector<2xf32>
    %86 = vector.multi_reduction <maximumf>, %84, %cst_49 [1] : vector<2x4xf32> to vector<2xf32>
    %87 = vector.shape_cast %86 : vector<2xf32> to vector<2x1xf32>
    %88 = vector.broadcast %87 : vector<2x1xf32> to vector<2x4xf32>
    %89 = arith.cmpf oeq, %84, %88 : vector<2x4xf32>
    %c4_i32 = arith.constant 4 : i32
    %90 = vector.broadcast %c4_i32 : i32 to vector<2x4xi32>
    %91 = arith.select %89, %85, %90 : vector<2x4xi1>, vector<2x4xi32>
    %cst_50 = arith.constant dense<2147483647> : vector<2xi32>
    %92 = vector.multi_reduction <minsi>, %91, %cst_50 [1] : vector<2x4xi32> to vector<2xi32>
    %93 = vector.shape_cast %92 : vector<2xi32> to vector<2x1xi32>
    %94 = vector.broadcast %93 : vector<2x1xi32> to vector<2x4xi32>
    %95 = arith.cmpi eq, %85, %94 : vector<2x4xi32>
    %96 = arith.extui %95 : vector<2x4xi1> to vector<2x4xi32>
    %97 = arith.sitofp %96 : vector<2x4xi32> to vector<2x4xf32>
    %98 = arith.subf %97, %84 : vector<2x4xf32>
    %99 = arith.addf %98, %84 : vector<2x4xf32>
    %c0_51 = arith.constant 0 : index
    %c0_52 = arith.constant 0 : index
    %100 = vector.load %arg19[%c0_51, %c0_52] : memref<2x4xf32, #tpu.memory_space<vmem>>, vector<2x4xf32>
    tpu.vector_store %arg19[%c0_51, %c0_52], %99 {strides = array<i32>} : memref<2x4xf32, #tpu.memory_space<vmem>>, vector<2x4xf32>,
    %c0_53 = arith.constant 0 : index
    %c0_54 = arith.constant 0 : index
    %101 = vector.load %arg14[%c0_53, %c0_54] : memref<128x4xf32, #tpu.memory_space<vmem>>, vector<128x4xf32>
    %cst_55 = arith.constant dense<0.000000e+00> : vector<2x4xf32>
    %102 = tpu.matmul %46, %101, %cst_55 {dimension_numbers = #tpu.dot_dimension_numbers<[1], [0], [0], [1], [0, 0, 1, 1], [], []>} : vector<2x128xf32>, vector<128x4xf32>, vector<2x4xf32> -> vector<2x4xf32>
    %c0_56 = arith.constant 0 : index
    %c0_57 = arith.constant 0 : index
    %103 = vector.load %arg15[%c0_56, %c0_57] : memref<1x4xf32, #tpu.memory_space<vmem>>, vector<1x4xf32>
    %104 = vector.broadcast %103 : vector<1x4xf32> to vector<2x4xf32>
    %105 = arith.addf %102, %104 : vector<2x4xf32>
    %cst_58 = arith.constant dense<0xFF800000> : vector<2xf32>
    %106 = vector.multi_reduction <maximumf>, %105, %cst_58 [1] : vector<2x4xf32> to vector<2xf32>
    %107 = vector.shape_cast %106 : vector<2xf32> to vector<2x1xf32>
    %108 = vector.broadcast %107 : vector<2x1xf32> to vector<2x4xf32>
    %109 = arith.subf %105, %108 : vector<2x4xf32>
    %110 = math.exp %109 : vector<2x4xf32>
    %cst_59 = arith.constant dense<0.000000e+00> : vector<2xf32>
    %111 = vector.multi_reduction <add>, %110, %cst_59 [1] : vector<2x4xf32> to vector<2xf32>
    %112 = vector.shape_cast %111 : vector<2xf32> to vector<2x1xf32>
    %113 = vector.broadcast %112 : vector<2x1xf32> to vector<2x4xf32>
    %114 = arith.divf %110, %113 : vector<2x4xf32>
    %c0_60 = arith.constant 0 : index
    %c0_61 = arith.constant 0 : index
    %115 = vector.load %arg20[%c0_60, %c0_61] : memref<2x4xf32, #tpu.memory_space<vmem>>, vector<2x4xf32>
    tpu.vector_store %arg20[%c0_60, %c0_61], %114 {strides = array<i32>} : memref<2x4xf32, #tpu.memory_space<vmem>>, vector<2x4xf32>,
    %116 = vector.extract_strided_slice %13 {offsets = [0, 0, 0], sizes = [2, 1, 128], strides = [1, 1, 1]} : vector<2x8x128xf32> to vector<2x1x128xf32>
    %117 = vector.shape_cast %116 : vector<2x1x128xf32> to vector<2x128xf32>
    %c0_62 = arith.constant 0 : index
    %c0_63 = arith.constant 0 : index
    %118 = vector.load %arg16[%c0_62, %c0_63] : memref<256x1xf32, #tpu.memory_space<vmem>>, vector<256x1xf32>
    %119 = vector.extract_strided_slice %118 {offsets = [0, 0], sizes = [128, 1], strides = [1, 1]} : vector<256x1xf32> to vector<128x1xf32>
    %cst_64 = arith.constant dense<0.000000e+00> : vector<2x1xf32>
    %120 = tpu.matmul %46, %119, %cst_64 {dimension_numbers = #tpu.dot_dimension_numbers<[1], [0], [0], [1], [0, 0, 1, 1], [], []>} : vector<2x128xf32>, vector<128x1xf32>, vector<2x1xf32> -> vector<2x1xf32>
    %121 = vector.extract_strided_slice %118 {offsets = [128, 0], sizes = [128, 1], strides = [1, 1]} : vector<256x1xf32> to vector<128x1xf32>
    %cst_65 = arith.constant dense<0.000000e+00> : vector<2x1xf32>
    %122 = tpu.matmul %117, %121, %cst_65 {dimension_numbers = #tpu.dot_dimension_numbers<[1], [0], [0], [1], [0, 0, 1, 1], [], []>} : vector<2x128xf32>, vector<128x1xf32>, vector<2x1xf32> -> vector<2x1xf32>
    %123 = arith.addf %120, %122 : vector<2x1xf32>
    %c0_66 = arith.constant 0 : index
    %c0_67 = arith.constant 0 : index
    %124 = vector.load %arg17[%c0_66, %c0_67] : memref<1x1xf32, #tpu.memory_space<vmem>>, vector<1x1xf32>
    %125 = vector.broadcast %124 : vector<1x1xf32> to vector<2x1xf32>
    %126 = arith.addf %123, %125 : vector<2x1xf32>
    %127 = arith.negf %126 : vector<2x1xf32>
    %128 = math.exp %127 : vector<2x1xf32>
    %cst_68 = arith.constant 1.000000e+00 : f32
    %129 = vector.broadcast %cst_68 : f32 to vector<2x1xf32>
    %130 = arith.addf %129, %128 : vector<2x1xf32>
    %131 = arith.divf %129, %130 : vector<2x1xf32>
    %c0_69 = arith.constant 0 : index
    %c0_70 = arith.constant 0 : index
    %132 = vector.load %arg18[%c0_69, %c0_70] : memref<2x1xf32, #tpu.memory_space<vmem>>, vector<2x1xf32>
    tpu.vector_store %arg18[%c0_69, %c0_70], %131 {strides = array<i32>} : memref<2x1xf32, #tpu.memory_space<vmem>>, vector<2x1xf32>,
    return
  }
}

module attributes {stable_mosaic.version = 11 : i64} {
  func.func @_encoder_kernel(%arg0: i32, %arg1: memref<1x2x8x128xf32, #tpu.memory_space<vmem>>, %arg2: memref<1x2x8xf32, #tpu.memory_space<vmem>>, %arg3: memref<1x128xf32, #tpu.memory_space<vmem>>, %arg4: memref<1x128xf32, #tpu.memory_space<vmem>>, %arg5: memref<128x384xf32, #tpu.memory_space<vmem>>, %arg6: memref<1x384xf32, #tpu.memory_space<vmem>>, %arg7: memref<128x128xf32, #tpu.memory_space<vmem>>, %arg8: memref<1x128xf32, #tpu.memory_space<vmem>>, %arg9: memref<1x128xf32, #tpu.memory_space<vmem>>, %arg10: memref<1x128xf32, #tpu.memory_space<vmem>>, %arg11: memref<128x128xf32, #tpu.memory_space<vmem>>, %arg12: memref<1x128xf32, #tpu.memory_space<vmem>>, %arg13: memref<128x128xf32, #tpu.memory_space<vmem>>, %arg14: memref<1x128xf32, #tpu.memory_space<vmem>>, %arg15: memref<1x128xf32, #tpu.memory_space<vmem>>, %arg16: memref<1x128xf32, #tpu.memory_space<vmem>>, %arg17: memref<1x2x8x128xf32, #tpu.memory_space<vmem>>) attributes {dimension_semantics = [#tpu.dimension_semantics<parallel>], iteration_bounds = array<i64: 2>, scalar_prefetch = 0 : i64, scratch_operands = 0 : i64, tpu.core_type = #tpu.core_type<tc>, window_params = [{transform_indices = @transform_0, window_bounds = array<i64: 1, 2, 8, 128>}, {transform_indices = @transform_1, window_bounds = array<i64: 1, 2, 8>}, {pipeline_mode = #tpu.pipeline_mode<synchronous>, transform_indices = @transform_2, window_bounds = array<i64: 1, 128>}, {pipeline_mode = #tpu.pipeline_mode<synchronous>, transform_indices = @transform_3, window_bounds = array<i64: 1, 128>}, {pipeline_mode = #tpu.pipeline_mode<synchronous>, transform_indices = @transform_4, window_bounds = array<i64: 128, 384>}, {pipeline_mode = #tpu.pipeline_mode<synchronous>, transform_indices = @transform_5, window_bounds = array<i64: 1, 384>}, {pipeline_mode = #tpu.pipeline_mode<synchronous>, transform_indices = @transform_6, window_bounds = array<i64: 128, 128>}, {pipeline_mode = #tpu.pipeline_mode<synchronous>, transform_indices = @transform_7, window_bounds = array<i64: 1, 128>}, {pipeline_mode = #tpu.pipeline_mode<synchronous>, transform_indices = @transform_8, window_bounds = array<i64: 1, 128>}, {pipeline_mode = #tpu.pipeline_mode<synchronous>, transform_indices = @transform_9, window_bounds = array<i64: 1, 128>}, {pipeline_mode = #tpu.pipeline_mode<synchronous>, transform_indices = @transform_10, window_bounds = array<i64: 128, 128>}, {pipeline_mode = #tpu.pipeline_mode<synchronous>, transform_indices = @transform_11, window_bounds = array<i64: 1, 128>}, {pipeline_mode = #tpu.pipeline_mode<synchronous>, transform_indices = @transform_12, window_bounds = array<i64: 128, 128>}, {pipeline_mode = #tpu.pipeline_mode<synchronous>, transform_indices = @transform_13, window_bounds = array<i64: 1, 128>}, {pipeline_mode = #tpu.pipeline_mode<synchronous>, transform_indices = @transform_14, window_bounds = array<i64: 1, 128>}, {pipeline_mode = #tpu.pipeline_mode<synchronous>, transform_indices = @transform_15, window_bounds = array<i64: 1, 128>}, {transform_indices = @transform_16, window_bounds = array<i64: 1, 2, 8, 128>}]} {
    %c0 = arith.constant 0 : index
    %c0_0 = arith.constant 0 : index
    %c0_1 = arith.constant 0 : index
    %c0_2 = arith.constant 0 : index
    %0 = vector.load %arg1[%c0, %c0_0, %c0_1, %c0_2] : memref<1x2x8x128xf32, #tpu.memory_space<vmem>>, vector<1x2x8x128xf32>
    %1 = vector.shape_cast %0 : vector<1x2x8x128xf32> to vector<16x128xf32>
    %c0_3 = arith.constant 0 : index
    %c0_4 = arith.constant 0 : index
    %c0_5 = arith.constant 0 : index
    %2 = vector.load %arg2[%c0_3, %c0_4, %c0_5] : memref<1x2x8xf32, #tpu.memory_space<vmem>>, vector<1x2x8xf32>
    %3 = vector.shape_cast %2 : vector<1x2x8xf32> to vector<2x8xf32>
    %c0_6 = arith.constant 0 : index
    %c0_7 = arith.constant 0 : index
    %4 = vector.load %arg3[%c0_6, %c0_7] : memref<1x128xf32, #tpu.memory_space<vmem>>, vector<1x128xf32>
    %c0_8 = arith.constant 0 : index
    %c0_9 = arith.constant 0 : index
    %5 = vector.load %arg4[%c0_8, %c0_9] : memref<1x128xf32, #tpu.memory_space<vmem>>, vector<1x128xf32>
    %6 = tpu.iota {dimensions = array<i32: 1>} : vector<16x128xi32>
    %c32_i32 = arith.constant 32 : i32
    %7 = vector.broadcast %c32_i32 : i32 to vector<16x128xi32>
    %8 = arith.cmpi slt, %6, %7 : vector<16x128xi32>
    %9 = arith.extui %8 : vector<16x128xi1> to vector<16x128xi32>
    %10 = arith.sitofp %9 : vector<16x128xi32> to vector<16x128xf32>
    %11 = arith.mulf %1, %10 : vector<16x128xf32>
    %cst = arith.constant dense<0.000000e+00> : vector<16xf32>
    %12 = vector.multi_reduction <add>, %11, %cst [1] : vector<16x128xf32> to vector<16xf32>
    %13 = vector.shape_cast %12 : vector<16xf32> to vector<16x1xf32>
    %cst_10 = arith.constant 3.125000e-02 : f32
    %14 = vector.broadcast %cst_10 : f32 to vector<16x1xf32>
    %15 = arith.mulf %13, %14 : vector<16x1xf32>
    %16 = vector.broadcast %15 : vector<16x1xf32> to vector<16x128xf32>
    %17 = arith.subf %1, %16 : vector<16x128xf32>
    %18 = arith.mulf %17, %10 : vector<16x128xf32>
    %19 = arith.mulf %18, %18 : vector<16x128xf32>
    %cst_11 = arith.constant dense<0.000000e+00> : vector<16xf32>
    %20 = vector.multi_reduction <add>, %19, %cst_11 [1] : vector<16x128xf32> to vector<16xf32>
    %21 = vector.shape_cast %20 : vector<16xf32> to vector<16x1xf32>
    %cst_12 = arith.constant 3.125000e-02 : f32
    %22 = vector.broadcast %cst_12 : f32 to vector<16x1xf32>
    %23 = arith.mulf %21, %22 : vector<16x1xf32>
    %24 = vector.broadcast %15 : vector<16x1xf32> to vector<16x128xf32>
    %25 = arith.subf %1, %24 : vector<16x128xf32>
    %cst_13 = arith.constant 9.99999996E-13 : f32
    %26 = vector.broadcast %cst_13 : f32 to vector<16x1xf32>
    %27 = arith.addf %23, %26 : vector<16x1xf32>
    %28 = math.rsqrt %27 : vector<16x1xf32>
    %29 = vector.broadcast %28 : vector<16x1xf32> to vector<16x128xf32>
    %30 = arith.mulf %25, %29 : vector<16x128xf32>
    %31 = vector.broadcast %4 : vector<1x128xf32> to vector<16x128xf32>
    %32 = arith.mulf %30, %31 : vector<16x128xf32>
    %33 = vector.broadcast %5 : vector<1x128xf32> to vector<16x128xf32>
    %34 = arith.addf %32, %33 : vector<16x128xf32>
    %c0_14 = arith.constant 0 : index
    %c0_15 = arith.constant 0 : index
    %35 = vector.load %arg5[%c0_14, %c0_15] : memref<128x384xf32, #tpu.memory_space<vmem>>, vector<128x384xf32>
    %cst_16 = arith.constant dense<0.000000e+00> : vector<16x384xf32>
    %36 = tpu.matmul %34, %35, %cst_16 {dimension_numbers = #tpu.dot_dimension_numbers<[1], [0], [0], [1], [0, 0, 1, 1], [], []>} : vector<16x128xf32>, vector<128x384xf32>, vector<16x384xf32> -> vector<16x384xf32>
    %c0_17 = arith.constant 0 : index
    %c0_18 = arith.constant 0 : index
    %37 = vector.load %arg6[%c0_17, %c0_18] : memref<1x384xf32, #tpu.memory_space<vmem>>, vector<1x384xf32>
    %38 = vector.broadcast %37 : vector<1x384xf32> to vector<16x384xf32>
    %39 = arith.addf %36, %38 : vector<16x384xf32>
    %40 = vector.extract_strided_slice %39 {offsets = [0, 0], sizes = [16, 128], strides = [1, 1]} : vector<16x384xf32> to vector<16x128xf32>
    %41 = vector.shape_cast %40 : vector<16x128xf32> to vector<2x8x128xf32>
    %42 = vector.extract_strided_slice %39 {offsets = [0, 128], sizes = [16, 128], strides = [1, 1]} : vector<16x384xf32> to vector<16x128xf32>
    %43 = vector.shape_cast %42 : vector<16x128xf32> to vector<2x8x128xf32>
    %44 = vector.extract_strided_slice %39 {offsets = [0, 256], sizes = [16, 128], strides = [1, 1]} : vector<16x384xf32> to vector<16x128xf32>
    %45 = vector.shape_cast %44 : vector<16x128xf32> to vector<2x8x128xf32>
    "tpu.trace_start"() <{level = 10 : i32, message = "bqd,bkd->bqk"}> : () -> ()
    %cst_19 = arith.constant dense<0.000000e+00> : vector<2x8x8xf32>
    %46 = tpu.matmul %41, %43, %cst_19 {dimension_numbers = #tpu.dot_dimension_numbers<[2], [2], [1], [1], [0, 0, 0, 1, 1, 1], [0], [0]>} : vector<2x8x128xf32>, vector<2x8x128xf32>, vector<2x8x8xf32> -> vector<2x8x8xf32>
    "tpu.trace_stop"() : () -> ()
    %cst_20 = arith.constant 0.176776692 : f32
    %47 = vector.broadcast %cst_20 : f32 to vector<2x8x8xf32>
    %48 = arith.mulf %46, %47 : vector<2x8x8xf32>
    %cst_21 = arith.constant 1.000000e+00 : f32
    %49 = vector.broadcast %cst_21 : f32 to vector<2x8xf32>
    %50 = arith.subf %49, %3 : vector<2x8xf32>
    %51 = vector.shape_cast %50 : vector<2x8xf32> to vector<2x1x8xf32>
    %cst_22 = arith.constant -1.000000e+09 : f32
    %52 = vector.broadcast %cst_22 : f32 to vector<2x1x8xf32>
    %53 = arith.mulf %51, %52 : vector<2x1x8xf32>
    %54 = vector.broadcast %53 : vector<2x1x8xf32> to vector<2x8x8xf32>
    %55 = arith.addf %48, %54 : vector<2x8x8xf32>
    %cst_23 = arith.constant dense<0xFF800000> : vector<2x8xf32>
    %56 = vector.multi_reduction <maximumf>, %55, %cst_23 [2] : vector<2x8x8xf32> to vector<2x8xf32>
    %57 = vector.shape_cast %56 : vector<2x8xf32> to vector<2x8x1xf32>
    %58 = vector.broadcast %57 : vector<2x8x1xf32> to vector<2x8x8xf32>
    %59 = arith.subf %55, %58 : vector<2x8x8xf32>
    %60 = math.exp %59 : vector<2x8x8xf32>
    %cst_24 = arith.constant dense<0.000000e+00> : vector<2x8xf32>
    %61 = vector.multi_reduction <add>, %60, %cst_24 [2] : vector<2x8x8xf32> to vector<2x8xf32>
    %62 = vector.shape_cast %61 : vector<2x8xf32> to vector<2x8x1xf32>
    %63 = vector.broadcast %62 : vector<2x8x1xf32> to vector<2x8x8xf32>
    %64 = arith.divf %60, %63 : vector<2x8x8xf32>
    "tpu.trace_start"() <{level = 10 : i32, message = "bqk,bkd->bqd"}> : () -> ()
    %cst_25 = arith.constant dense<0.000000e+00> : vector<2x8x128xf32>
    %65 = tpu.matmul %64, %45, %cst_25 {dimension_numbers = #tpu.dot_dimension_numbers<[2], [1], [1], [2], [0, 0, 0, 1, 1, 2], [0], [0]>} : vector<2x8x8xf32>, vector<2x8x128xf32>, vector<2x8x128xf32> -> vector<2x8x128xf32>
    "tpu.trace_stop"() : () -> ()
    %66 = vector.shape_cast %65 : vector<2x8x128xf32> to vector<16x128xf32>
    %c0_26 = arith.constant 0 : index
    %c0_27 = arith.constant 0 : index
    %67 = vector.load %arg7[%c0_26, %c0_27] : memref<128x128xf32, #tpu.memory_space<vmem>>, vector<128x128xf32>
    %cst_28 = arith.constant dense<0.000000e+00> : vector<16x128xf32>
    %68 = tpu.matmul %66, %67, %cst_28 {dimension_numbers = #tpu.dot_dimension_numbers<[1], [0], [0], [1], [0, 0, 1, 1], [], []>} : vector<16x128xf32>, vector<128x128xf32>, vector<16x128xf32> -> vector<16x128xf32>
    %c0_29 = arith.constant 0 : index
    %c0_30 = arith.constant 0 : index
    %69 = vector.load %arg8[%c0_29, %c0_30] : memref<1x128xf32, #tpu.memory_space<vmem>>, vector<1x128xf32>
    %70 = vector.broadcast %69 : vector<1x128xf32> to vector<16x128xf32>
    %71 = arith.addf %68, %70 : vector<16x128xf32>
    %72 = arith.addf %34, %71 : vector<16x128xf32>
    %c0_31 = arith.constant 0 : index
    %c0_32 = arith.constant 0 : index
    %73 = vector.load %arg9[%c0_31, %c0_32] : memref<1x128xf32, #tpu.memory_space<vmem>>, vector<1x128xf32>
    %c0_33 = arith.constant 0 : index
    %c0_34 = arith.constant 0 : index
    %74 = vector.load %arg10[%c0_33, %c0_34] : memref<1x128xf32, #tpu.memory_space<vmem>>, vector<1x128xf32>
    %75 = tpu.iota {dimensions = array<i32: 1>} : vector<16x128xi32>
    %c32_i32_35 = arith.constant 32 : i32
    %76 = vector.broadcast %c32_i32_35 : i32 to vector<16x128xi32>
    %77 = arith.cmpi slt, %75, %76 : vector<16x128xi32>
    %78 = arith.extui %77 : vector<16x128xi1> to vector<16x128xi32>
    %79 = arith.sitofp %78 : vector<16x128xi32> to vector<16x128xf32>
    %80 = arith.mulf %72, %79 : vector<16x128xf32>
    %cst_36 = arith.constant dense<0.000000e+00> : vector<16xf32>
    %81 = vector.multi_reduction <add>, %80, %cst_36 [1] : vector<16x128xf32> to vector<16xf32>
    %82 = vector.shape_cast %81 : vector<16xf32> to vector<16x1xf32>
    %cst_37 = arith.constant 3.125000e-02 : f32
    %83 = vector.broadcast %cst_37 : f32 to vector<16x1xf32>
    %84 = arith.mulf %82, %83 : vector<16x1xf32>
    %85 = vector.broadcast %84 : vector<16x1xf32> to vector<16x128xf32>
    %86 = arith.subf %72, %85 : vector<16x128xf32>
    %87 = arith.mulf %86, %79 : vector<16x128xf32>
    %88 = arith.mulf %87, %87 : vector<16x128xf32>
    %cst_38 = arith.constant dense<0.000000e+00> : vector<16xf32>
    %89 = vector.multi_reduction <add>, %88, %cst_38 [1] : vector<16x128xf32> to vector<16xf32>
    %90 = vector.shape_cast %89 : vector<16xf32> to vector<16x1xf32>
    %cst_39 = arith.constant 3.125000e-02 : f32
    %91 = vector.broadcast %cst_39 : f32 to vector<16x1xf32>
    %92 = arith.mulf %90, %91 : vector<16x1xf32>
    %93 = vector.broadcast %84 : vector<16x1xf32> to vector<16x128xf32>
    %94 = arith.subf %72, %93 : vector<16x128xf32>
    %cst_40 = arith.constant 9.99999996E-13 : f32
    %95 = vector.broadcast %cst_40 : f32 to vector<16x1xf32>
    %96 = arith.addf %92, %95 : vector<16x1xf32>
    %97 = math.rsqrt %96 : vector<16x1xf32>
    %98 = vector.broadcast %97 : vector<16x1xf32> to vector<16x128xf32>
    %99 = arith.mulf %94, %98 : vector<16x128xf32>
    %100 = vector.broadcast %73 : vector<1x128xf32> to vector<16x128xf32>
    %101 = arith.mulf %99, %100 : vector<16x128xf32>
    %102 = vector.broadcast %74 : vector<1x128xf32> to vector<16x128xf32>
    %103 = arith.addf %101, %102 : vector<16x128xf32>
    %c0_41 = arith.constant 0 : index
    %c0_42 = arith.constant 0 : index
    %104 = vector.load %arg11[%c0_41, %c0_42] : memref<128x128xf32, #tpu.memory_space<vmem>>, vector<128x128xf32>
    %cst_43 = arith.constant dense<0.000000e+00> : vector<16x128xf32>
    %105 = tpu.matmul %103, %104, %cst_43 {dimension_numbers = #tpu.dot_dimension_numbers<[1], [0], [0], [1], [0, 0, 1, 1], [], []>} : vector<16x128xf32>, vector<128x128xf32>, vector<16x128xf32> -> vector<16x128xf32>
    %c0_44 = arith.constant 0 : index
    %c0_45 = arith.constant 0 : index
    %106 = vector.load %arg12[%c0_44, %c0_45] : memref<1x128xf32, #tpu.memory_space<vmem>>, vector<1x128xf32>
    %107 = vector.broadcast %106 : vector<1x128xf32> to vector<16x128xf32>
    %108 = arith.addf %105, %107 : vector<16x128xf32>
    %109 = arith.mulf %108, %108 : vector<16x128xf32>
    %110 = arith.mulf %108, %109 : vector<16x128xf32>
    %cst_46 = arith.constant 4.471500e-02 : f32
    %111 = vector.broadcast %cst_46 : f32 to vector<16x128xf32>
    %112 = arith.mulf %111, %110 : vector<16x128xf32>
    %113 = arith.addf %108, %112 : vector<16x128xf32>
    %cst_47 = arith.constant 0.797884583 : f32
    %114 = vector.broadcast %cst_47 : f32 to vector<16x128xf32>
    %115 = arith.mulf %114, %113 : vector<16x128xf32>
    %116 = math.tanh %115 : vector<16x128xf32>
    %cst_48 = arith.constant 1.000000e+00 : f32
    %117 = vector.broadcast %cst_48 : f32 to vector<16x128xf32>
    %118 = arith.addf %117, %116 : vector<16x128xf32>
    %cst_49 = arith.constant 5.000000e-01 : f32
    %119 = vector.broadcast %cst_49 : f32 to vector<16x128xf32>
    %120 = arith.mulf %119, %118 : vector<16x128xf32>
    %121 = arith.mulf %108, %120 : vector<16x128xf32>
    %c0_50 = arith.constant 0 : index
    %c0_51 = arith.constant 0 : index
    %122 = vector.load %arg13[%c0_50, %c0_51] : memref<128x128xf32, #tpu.memory_space<vmem>>, vector<128x128xf32>
    %cst_52 = arith.constant dense<0.000000e+00> : vector<16x128xf32>
    %123 = tpu.matmul %121, %122, %cst_52 {dimension_numbers = #tpu.dot_dimension_numbers<[1], [0], [0], [1], [0, 0, 1, 1], [], []>} : vector<16x128xf32>, vector<128x128xf32>, vector<16x128xf32> -> vector<16x128xf32>
    %c0_53 = arith.constant 0 : index
    %c0_54 = arith.constant 0 : index
    %124 = vector.load %arg14[%c0_53, %c0_54] : memref<1x128xf32, #tpu.memory_space<vmem>>, vector<1x128xf32>
    %125 = vector.broadcast %124 : vector<1x128xf32> to vector<16x128xf32>
    %126 = arith.addf %123, %125 : vector<16x128xf32>
    %127 = arith.addf %103, %126 : vector<16x128xf32>
    %c0_55 = arith.constant 0 : index
    %c0_56 = arith.constant 0 : index
    %128 = vector.load %arg15[%c0_55, %c0_56] : memref<1x128xf32, #tpu.memory_space<vmem>>, vector<1x128xf32>
    %c0_57 = arith.constant 0 : index
    %c0_58 = arith.constant 0 : index
    %129 = vector.load %arg16[%c0_57, %c0_58] : memref<1x128xf32, #tpu.memory_space<vmem>>, vector<1x128xf32>
    %130 = tpu.iota {dimensions = array<i32: 1>} : vector<16x128xi32>
    %c32_i32_59 = arith.constant 32 : i32
    %131 = vector.broadcast %c32_i32_59 : i32 to vector<16x128xi32>
    %132 = arith.cmpi slt, %130, %131 : vector<16x128xi32>
    %133 = arith.extui %132 : vector<16x128xi1> to vector<16x128xi32>
    %134 = arith.sitofp %133 : vector<16x128xi32> to vector<16x128xf32>
    %135 = arith.mulf %127, %134 : vector<16x128xf32>
    %cst_60 = arith.constant dense<0.000000e+00> : vector<16xf32>
    %136 = vector.multi_reduction <add>, %135, %cst_60 [1] : vector<16x128xf32> to vector<16xf32>
    %137 = vector.shape_cast %136 : vector<16xf32> to vector<16x1xf32>
    %cst_61 = arith.constant 3.125000e-02 : f32
    %138 = vector.broadcast %cst_61 : f32 to vector<16x1xf32>
    %139 = arith.mulf %137, %138 : vector<16x1xf32>
    %140 = vector.broadcast %139 : vector<16x1xf32> to vector<16x128xf32>
    %141 = arith.subf %127, %140 : vector<16x128xf32>
    %142 = arith.mulf %141, %134 : vector<16x128xf32>
    %143 = arith.mulf %142, %142 : vector<16x128xf32>
    %cst_62 = arith.constant dense<0.000000e+00> : vector<16xf32>
    %144 = vector.multi_reduction <add>, %143, %cst_62 [1] : vector<16x128xf32> to vector<16xf32>
    %145 = vector.shape_cast %144 : vector<16xf32> to vector<16x1xf32>
    %cst_63 = arith.constant 3.125000e-02 : f32
    %146 = vector.broadcast %cst_63 : f32 to vector<16x1xf32>
    %147 = arith.mulf %145, %146 : vector<16x1xf32>
    %148 = vector.broadcast %139 : vector<16x1xf32> to vector<16x128xf32>
    %149 = arith.subf %127, %148 : vector<16x128xf32>
    %cst_64 = arith.constant 9.99999996E-13 : f32
    %150 = vector.broadcast %cst_64 : f32 to vector<16x1xf32>
    %151 = arith.addf %147, %150 : vector<16x1xf32>
    %152 = math.rsqrt %151 : vector<16x1xf32>
    %153 = vector.broadcast %152 : vector<16x1xf32> to vector<16x128xf32>
    %154 = arith.mulf %149, %153 : vector<16x128xf32>
    %155 = vector.broadcast %128 : vector<1x128xf32> to vector<16x128xf32>
    %156 = arith.mulf %154, %155 : vector<16x128xf32>
    %157 = vector.broadcast %129 : vector<1x128xf32> to vector<16x128xf32>
    %158 = arith.addf %156, %157 : vector<16x128xf32>
    %159 = vector.shape_cast %158 : vector<16x128xf32> to vector<1x2x8x128xf32>
    %c0_65 = arith.constant 0 : index
    %c0_66 = arith.constant 0 : index
    %c0_67 = arith.constant 0 : index
    %c0_68 = arith.constant 0 : index
    %160 = vector.load %arg17[%c0_65, %c0_66, %c0_67, %c0_68] : memref<1x2x8x128xf32, #tpu.memory_space<vmem>>, vector<1x2x8x128xf32>
    tpu.vector_store %arg17[%c0_65, %c0_66, %c0_67, %c0_68], %159 {strides = array<i32>} : memref<1x2x8x128xf32, #tpu.memory_space<vmem>>, vector<1x2x8x128xf32>,
    return
  }
  func.func @transform_0(%arg0: i32) -> (i32, i32, i32, i32) {
    %c0_i32 = arith.constant 0 : i32
    %c0_i32_0 = arith.constant 0 : i32
    %c0_i32_1 = arith.constant 0 : i32
    %c0_i32_2 = arith.constant 0 : i32
    return %arg0, %c0_i32, %c0_i32_0, %c0_i32_1 : i32, i32, i32, i32
  }
  func.func @transform_1(%arg0: i32) -> (i32, i32, i32) {
    %c0_i32 = arith.constant 0 : i32
    %c0_i32_0 = arith.constant 0 : i32
    %c0_i32_1 = arith.constant 0 : i32
    return %arg0, %c0_i32, %c0_i32_0 : i32, i32, i32
  }
  func.func @transform_2(%arg0: i32) -> (i32, i32) {
    %c0_i32 = arith.constant 0 : i32
    %c0_i32_0 = arith.constant 0 : i32
    %c0_i32_1 = arith.constant 0 : i32
    return %c0_i32, %c0_i32_0 : i32, i32
  }
  func.func @transform_3(%arg0: i32) -> (i32, i32) {
    %c0_i32 = arith.constant 0 : i32
    %c0_i32_0 = arith.constant 0 : i32
    %c0_i32_1 = arith.constant 0 : i32
    return %c0_i32, %c0_i32_0 : i32, i32
  }
  func.func @transform_4(%arg0: i32) -> (i32, i32) {
    %c0_i32 = arith.constant 0 : i32
    %c0_i32_0 = arith.constant 0 : i32
    %c0_i32_1 = arith.constant 0 : i32
    return %c0_i32, %c0_i32_0 : i32, i32
  }
  func.func @transform_5(%arg0: i32) -> (i32, i32) {
    %c0_i32 = arith.constant 0 : i32
    %c0_i32_0 = arith.constant 0 : i32
    %c0_i32_1 = arith.constant 0 : i32
    return %c0_i32, %c0_i32_0 : i32, i32
  }
  func.func @transform_6(%arg0: i32) -> (i32, i32) {
    %c0_i32 = arith.constant 0 : i32
    %c0_i32_0 = arith.constant 0 : i32
    %c0_i32_1 = arith.constant 0 : i32
    return %c0_i32, %c0_i32_0 : i32, i32
  }
  func.func @transform_7(%arg0: i32) -> (i32, i32) {
    %c0_i32 = arith.constant 0 : i32
    %c0_i32_0 = arith.constant 0 : i32
    %c0_i32_1 = arith.constant 0 : i32
    return %c0_i32, %c0_i32_0 : i32, i32
  }
  func.func @transform_8(%arg0: i32) -> (i32, i32) {
    %c0_i32 = arith.constant 0 : i32
    %c0_i32_0 = arith.constant 0 : i32
    %c0_i32_1 = arith.constant 0 : i32
    return %c0_i32, %c0_i32_0 : i32, i32
  }
  func.func @transform_9(%arg0: i32) -> (i32, i32) {
    %c0_i32 = arith.constant 0 : i32
    %c0_i32_0 = arith.constant 0 : i32
    %c0_i32_1 = arith.constant 0 : i32
    return %c0_i32, %c0_i32_0 : i32, i32
  }
  func.func @transform_10(%arg0: i32) -> (i32, i32) {
    %c0_i32 = arith.constant 0 : i32
    %c0_i32_0 = arith.constant 0 : i32
    %c0_i32_1 = arith.constant 0 : i32
    return %c0_i32, %c0_i32_0 : i32, i32
  }
  func.func @transform_11(%arg0: i32) -> (i32, i32) {
    %c0_i32 = arith.constant 0 : i32
    %c0_i32_0 = arith.constant 0 : i32
    %c0_i32_1 = arith.constant 0 : i32
    return %c0_i32, %c0_i32_0 : i32, i32
  }
  func.func @transform_12(%arg0: i32) -> (i32, i32) {
    %c0_i32 = arith.constant 0 : i32
    %c0_i32_0 = arith.constant 0 : i32
    %c0_i32_1 = arith.constant 0 : i32
    return %c0_i32, %c0_i32_0 : i32, i32
  }
  func.func @transform_13(%arg0: i32) -> (i32, i32) {
    %c0_i32 = arith.constant 0 : i32
    %c0_i32_0 = arith.constant 0 : i32
    %c0_i32_1 = arith.constant 0 : i32
    return %c0_i32, %c0_i32_0 : i32, i32
  }
  func.func @transform_14(%arg0: i32) -> (i32, i32) {
    %c0_i32 = arith.constant 0 : i32
    %c0_i32_0 = arith.constant 0 : i32
    %c0_i32_1 = arith.constant 0 : i32
    return %c0_i32, %c0_i32_0 : i32, i32
  }
  func.func @transform_15(%arg0: i32) -> (i32, i32) {
    %c0_i32 = arith.constant 0 : i32
    %c0_i32_0 = arith.constant 0 : i32
    %c0_i32_1 = arith.constant 0 : i32
    return %c0_i32, %c0_i32_0 : i32, i32
  }
  func.func @transform_16(%arg0: i32) -> (i32, i32, i32, i32) {
    %c0_i32 = arith.constant 0 : i32
    %c0_i32_0 = arith.constant 0 : i32
    %c0_i32_1 = arith.constant 0 : i32
    %c0_i32_2 = arith.constant 0 : i32
    return %arg0, %c0_i32, %c0_i32_0, %c0_i32_1 : i32, i32, i32, i32
  }
}

</mosaic_0001>

<bundles_post_ra>
// kernel: forward.3
= control target key start
LH: loop header
LB: loop body
LE: loop exit
PB: predicated region body
PF: predicated region fallthrough
CT: control target
= control target key end

     0   :  { %s2592_s0 = inlined_call_operand.vmem [shape: f32[2,4,16], index: 0, kind: input, shape index: {}]   ;;  %s2593_s1 = inlined_call_operand.vmem [shape: f32[2,8,128], index: 1, kind: input, shape index: {}]   ;;  %s2594_s2 = inlined_call_operand.vmem [shape: f32[2,128], index: 2, kind: input, shape index: {}]   ;;  %s2595_s3 = inlined_call_operand.vmem [shape: f32[2,4], index: 3, kind: input, shape index: {}]   ;;  %s2596_s4 = inlined_call_operand.vmem [shape: f32[16,128], index: 4, kind: input, shape index: {}]   ;;  %s2597_s5 = inlined_call_operand.vmem [shape: f32[1,128], index: 5, kind: input, shape index: {}, may-alias: {5,7,11}]   ;;  %s2598_s6 = inlined_call_operand.vmem [shape: f32[128,128], index: 6, kind: input, shape index: {}]   ;;  %s2599_s7 = inlined_call_operand.vmem [shape: f32[1,128], index: 7, kind: input, shape index: {}, may-alias: {5,7,11}]   ;;  %s2600_s8 = inlined_call_operand.vmem [shape: f32[128,256], index: 8, kind: input, shape index: {}]   ;;  %s2601_s9 = inlined_call_operand.vmem [shape: f32[1,256], index: 9, kind: input, shape index: {}]   ;;  %s2602_s10 = inlined_call_operand.vmem [shape: f32[128,128], index: 10, kind: input, shape index: {}]   ;;  %s2603_s11 = inlined_call_operand.vmem [shape: f32[1,128], index: 11, kind: input, shape index: {}, may-alias: {5,7,11}]   ;;  %s2604_s12 = inlined_call_operand.vmem [shape: f32[128,4], index: 12, kind: input, shape index: {}]   ;;  %s2605_s13 = inlined_call_operand.vmem [shape: f32[1,4], index: 13, kind: input, shape index: {}, may-alias: {13,15}]   ;;  %s2606_s14 = inlined_call_operand.vmem [shape: f32[128,4], index: 14, kind: input, shape index: {}]   ;;  %s2607_s15 = inlined_call_operand.vmem [shape: f32[1,4], index: 15, kind: input, shape index: {}, may-alias: {13,15}]   ;;  %s2608_s16 = inlined_call_operand.vmem [shape: f32[256,1], index: 16, kind: input, shape index: {}]   ;;  %s2609_s17 = inlined_call_operand.<no memory space> [shape: f32[1,1], index: 17, kind: input, shape index: {}]   ;;  %s2610_s18 = inlined_call_operand.vmem [shape: f32[2,1], index: 18, kind: output, shape index: {0}]   ;;  %s2611_s19 = inlined_call_operand.hbm [shape: f32[2,4], index: 19, kind: output, shape index: {1}]   ;;  %s2612_s20 = inlined_call_operand.hbm [shape: f32[2,4], index: 20, kind: output, shape index: {2}]  }
   0x1   :  { %2615 = sst [smem:[#allocation9_spill]] %s2592_s0  ;;  %v26_v0 = vstv %s2609_s17 }
   0x2   :  { %2616 = sst [smem:[#allocation10_spill]] %s2593_s1  ;;  %27 = vst [vmem:[#allocation2] sm:$0x1] %v26_v0 }
   0x3   :  { %2617 = sst [smem:[#allocation11_spill]] %s2594_s2 }
   0x4   :  { %2618 = sst [smem:[#allocation12_spill]] %s2595_s3 }
   0x5   :  { %2619 = sst [smem:[#allocation13_spill]] %s2596_s4 }
   0x6   :  { %28 = vsyncpa [#allocation4], 0  ;;  %s2620_s2 = sld [smem:[#allocation13_spill]]  ;;  %s2621_s28 = sld [smem:[#allocation9_spill]]  ;;  %v1914_v4 = vmov 0.0|0.0   ;;  %vm1915_vm0 = vmmov 0  }
   0x7   :  { %1653 = vmatprep.subr.bf16.mxu1 %v1914_v4  ;;  %v1916_v6 = vmov 0.0   ;;  %v252_v7 = vld [vmem:[%s2600_s8 + $0x8] sm:$0xff]  ;;  %v254_v8 = vld [vmem:[%s2600_s8 + $0x18] sm:$0xff]  ;;  %v251_v9 = vld [vmem:[%s2600_s8] sm:$0xff]  ;;  %vm80_vm1 = vcmask 130048  }
   0x8   :  { %1420 = vmatprep.mubr.msk.f32.mxu1 %vm1915_vm0, %v1916_v6  ;;  %v253_v10 = vld [vmem:[%s2600_s8 + $0x10] sm:$0xff]  ;;  %359 = vmatprep.mubr.f32.mxu0 %v1916_v6  ;;  %v1680_v11 = vpack.c.bf16 %v254_v8, %v252_v7  ;;  %v256_v13 = vld [vmem:[%s2600_s8 + $0x28] sm:$0xff]  ;;  %v258_v14 = vld [vmem:[%s2600_s8 + $0x38] sm:$0xff] }
   0x9   :  { %v1682_v12 = vpack.c.bf16 %v253_v10, %v251_v9  ;;  %v255_v15 = vld [vmem:[%s2600_s8 + $0x20] sm:$0xff]  ;;  %v1684_v16 = vpack.c.bf16 %v258_v14, %v256_v13  ;;  %v257_v17 = vld [vmem:[%s2600_s8 + $0x30] sm:$0xff]  ;;  %v154_v19 = vld [vmem:[%s2598_s6 + $0x8] sm:$0xff] }
   0xa   :  { %v153_v18 = vld [vmem:[%s2598_s6] sm:$0xff]  ;;  %1681 = vmatprep.subr.bf16.mxu0 %v1680_v11  ;;  %v260_v21 = vld [vmem:[%s2600_s8 + $0x48] sm:$0xff]  ;;  %v262_v22 = vld [vmem:[%s2600_s8 + $0x58] sm:$0xff]  ;;  %v1686_v23 = vpack.c.bf16 %v257_v17, %v255_v15 }
   0xb   :  { %v1657_v20 = vpack.c.bf16 %v154_v19, %v153_v18  ;;  %1683 = vmatpush1.bf16.msra.mxu0 %v1682_v12  ;;  %v155_v24 = vld [vmem:[%s2598_s6 + $0x10] sm:$0xff]  ;;  %v156_v25 = vld [vmem:[%s2598_s6 + $0x18] sm:$0xff]  ;;  %v1688_v26 = vpack.c.bf16 %v262_v22, %v260_v21  ;;  %v259_v27 = vld [vmem:[%s2600_s8 + $0x40] sm:$0xff] }
   0xc   :  { %v68_v1 = vld [vmem:[%s2620_s2] sm:$0xff]  ;;  %v69_v2 = vld [vmem:[%s2620_s2 + $0x8] sm:$0xff]  ;;  %1685 = vmatprep.subr.bf16.mxu0 %v1684_v16  ;;  %v261_v28 = vld [vmem:[%s2600_s8 + $0x50] sm:$0xff]  ;;  %v1660_v29 = vpack.c.bf16 %v156_v25, %v155_v24 }
   0xd   :  { %v1837_v3 = vld [vmem:[%s2621_s28] sm:$0xff]   ;;  %v1654_v5 = vpack.c.bf16 %v69_v2, %v68_v1  ;;  %v264_v30 = vld [vmem:[%s2600_s8 + $0x68] sm:$0xff]  ;;  %v266_v31 = vld [vmem:[%s2600_s8 + $0x78] sm:$0xff]  ;;  %v1690_v34 = vpack.c.bf16 %v261_v28, %v259_v27 }
   0xe   :  { %v157_v32 = vld [vmem:[%s2598_s6 + $0x20] sm:$0xff]  ;;  %v158_v33 = vld [vmem:[%s2598_s6 + $0x28] sm:$0xff]  ;;  %v1692_v35 = vpack.c.bf16 %v266_v31, %v264_v30  ;;  %v265_v37 = vld [vmem:[%s2600_s8 + $0x70] sm:$0xff] }
   0xf   :  { %1655 = vmatpush3.bf16.msra.mxu1 %v1654_v5  ;;  %1687 = vmatpush1.bf16.msra.mxu0 %v1686_v23  ;;  %v263_v36 = vld [vmem:[%s2600_s8 + $0x60] sm:$0xff]  ;;  %v1663_v38 = vpack.c.bf16 %v158_v33, %v157_v32  ;;  %v268_v39 = vld [vmem:[%s2600_s8 + $0x88] sm:$0xff]  ;;  %v270_v40 = vld [vmem:[%s2600_s8 + $0x98] sm:$0xff] }
  0x10   :  { %1656 = vmatprep.subr.bf16.mxu1 %v1914_v4  ;;  %1689 = vmatprep.subr.bf16.mxu0 %v1688_v26  ;;  %v159_v41 = vld [vmem:[%s2598_s6 + $0x30] sm:$0xff]  ;;  %v160_v42 = vld [vmem:[%s2598_s6 + $0x38] sm:$0xff]  ;;  %v1694_v43 = vpack.c.bf16 %v265_v37, %v263_v36  ;;  %v1696_v44 = vpack.c.bf16 %v270_v40, %v268_v39  ;;  %v267_v45 = vld [vmem:[%s2600_s8 + $0x80] sm:$0xff] }
  0x11   :  { %v269_v46 = vld [vmem:[%s2600_s8 + $0x90] sm:$0xff]  ;;  %v1666_v47 = vpack.c.bf16 %v160_v42, %v159_v41  ;;  %v272_v48 = vld [vmem:[%s2600_s8 + $0xa8] sm:$0xff]  ;;  %v274_v49 = vld [vmem:[%s2600_s8 + $0xb8] sm:$0xff] }
  0x12   :  { %1421 = vmatmul.mubr.msk.f32.vlgmr.msra.gmra.mrb[0].mxu1 %vm80_vm1, %v1837_v3  ;;  %v161_v50 = vld [vmem:[%s2598_s6 + $0x40] sm:$0xff]  ;;  %v162_v51 = vld [vmem:[%s2598_s6 + $0x48] sm:$0xff] }
  0x13   :  { %1658 = vmatpush3.bf16.msra.mxu1 %v1657_v20  ;;  %1455 = vmatprep.mubr.msk.f32.mxu1 %vm1915_vm0, %v1916_v6 }
  0x14   :  { %1659 = vmatprep.subr.bf16.mxu1 %v1914_v4  ;;  %1691 = vmatpush1.bf16.msra.mxu0 %v1690_v34 }
  0x15   :  { %1693 = vmatprep.subr.bf16.mxu0 %v1692_v35 }
  0x17   :  { %1661 = vmatpush3.bf16.msra.mxu1 %v1660_v29 }
  0x18   :  { %1662 = vmatprep.subr.bf16.mxu1 %v1914_v4 }
  0x1b   :  { %1664 = vmatpush3.bf16.msra.mxu1 %v1663_v38 }
  0x1c   :  { %1665 = vmatprep.subr.bf16.mxu1 %v1914_v4 }
  0x1d   :  { %29 = vsyncpa [#allocation6], 0  ;;  %1695 = vmatpush1.bf16.msra.mxu0 %v1694_v43  ;;  %v1698_v52 = vpack.c.bf16 %v269_v46, %v267_v45  ;;  %v1700_v53 = vpack.c.bf16 %v274_v49, %v272_v48  ;;  %v271_v54 = vld [vmem:[%s2600_s8 + $0xa0] sm:$0xff]  ;;  %v273_v55 = vld [vmem:[%s2600_s8 + $0xb0] sm:$0xff]  ;;  %v1669_v56 = vpack.c.bf16 %v162_v51, %v161_v50  ;;  %s2622_s27 = sld [smem:[#allocation10_spill]]  ;;  %v285_v19 = vlaneseq  ;;  %s2623_s21 = sld [smem:[#allocation11_spill]] }
  0x1e   :  { %1697 = vmatprep.subr.bf16.mxu0 %v1696_v44  ;;  %v276_v57 = vld [vmem:[%s2600_s8 + $0xc8] sm:$0xff]  ;;  %v278_v58 = vld [vmem:[%s2600_s8 + $0xd8] sm:$0xff]  ;;  %v163_v59 = vld [vmem:[%s2598_s6 + $0x50] sm:$0xff]  ;;  %v1702_v61 = vpack.c.bf16 %v273_v55, %v271_v54  ;;  %vm514_vm2 = vcmask 60416   ;;  %vm537_vm3 = vcmask 64512   ;;  %vm896_vm4 = vcmask 25600  }
  0x1f   :  { %1667 = vmatpush3.bf16.msra.mxu1 %v1666_v47  ;;  %v164_v60 = vld [vmem:[%s2598_s6 + $0x58] sm:$0xff]  ;;  %v1704_v62 = vpack.c.bf16 %v278_v58, %v276_v57  ;;  %v275_v63 = vld [vmem:[%s2600_s8 + $0xc0] sm:$0xff]  ;;  %v277_v0 = vld [vmem:[%s2600_s8 + $0xd0] sm:$0xff]  ;;  %v286_v20 = vshrl.u32 %v285_v19, 7  ;;  %vm982_vm5 = vcmask 1041409   ;;  %vm784_vm6 = vcmask 1043456  }
  0x20   :  { %1668 = vmatprep.subr.bf16.mxu1 %v1914_v4  ;;  %v1672_v1 = vpack.c.bf16 %v164_v60, %v163_v59  ;;  %v280_v2 = vld [vmem:[%s2600_s8 + $0xe8] sm:$0xff]  ;;  %v282_v3 = vld [vmem:[%s2600_s8 + $0xf8] sm:$0xff]  ;;  %v165_v5 = vld [vmem:[%s2598_s6 + $0x60] sm:$0xff]  ;;  %v1706_v8 = vpack.c.bf16 %v277_v0, %v275_v63  ;;  %s2624_s2 = sld [smem:[#allocation12_spill]]  ;;  %vm1258_vm7 = vcmask 1024  }
  0x21   :  { %1699 = vmatpush1.bf16.msra.mxu0 %v1698_v52  ;;  %v166_v7 = vld [vmem:[%s2598_s6 + $0x68] sm:$0xff]  ;;  %v1708_v9 = vpack.c.bf16 %v282_v3, %v280_v2  ;;  %v279_v10 = vld [vmem:[%s2600_s8 + $0xe0] sm:$0xff]  ;;  %v281_v11 = vld [vmem:[%s2600_s8 + $0xf0] sm:$0xff]  ;;  %v291_v22 = vsub.s32 1, %v286_v20  ;;  %v287_v28 = vsub.s32 0, %v286_v20 }
  0x22   :  { %1701 = vmatprep.subr.bf16.mxu0 %v1700_v53  ;;  %v1675_v12 = vpack.c.bf16 %v166_v7, %v165_v5  ;;  %v1710_v13 = vpack.c.bf16 %v281_v11, %v279_v10  ;;  %v167_v15 = vld [vmem:[%s2598_s6 + $0x70] sm:$0xff]  ;;  %v168_v16 = vld [vmem:[%s2598_s6 + $0x78] sm:$0xff]  ;;  %v283_v21 = vld [vmem:[%s2601_s9] sm:$0x3] }
  0x23   :  { %1670 = vmatpush3.bf16.msra.mxu1 %v1669_v56  ;;  %v2191_v14 = vld [vmem:[%s2622_s27] sm:$0xff]  ;;  %v1678_v17 = vpack.c.bf16 %v168_v16, %v167_v15  ;;  %v2205_v18 = vld [vmem:[%s2622_s27 + $0x8] sm:$0xff]  ;;  %v292_v23 = vrot.slane %v283_v21, %v291_v22  ;;  %v288_v29 = vrot.slane %v283_v21, %v287_v28  ;;  %v686_v63 = vld [vmem:[%s2602_s10 + $0x10] sm:$0xff] }
  0x24   :  { %1671 = vmatprep.subr.bf16.mxu1 %v1914_v4  ;;  %v1292_v24 = vld [vmem:[%s2597_s5] ss:$0 sm:$0xff]  ;;  %v689_v5 = vld [vmem:[%s2602_s10 + $0x28] sm:$0xff]  ;;  %v694_v15 = vld [vmem:[%s2602_s10 + $0x50] sm:$0xff] }
  0x25   :  { %1703 = vmatpush1.bf16.msra.mxu0 %v1702_v61  ;;  %v1294_v38 = vld [vmem:[%s2599_s7] ss:$0 sm:$0xff]  ;;  %v695_v16 = vld [vmem:[%s2602_s10 + $0x58] sm:$0xff] }
  0x26   :  { %1705 = vmatprep.subr.bf16.mxu0 %v1704_v62  ;;  %v684_v61 = vld [vmem:[%s2602_s10] sm:$0xff]  ;;  %v685_v62 = vld [vmem:[%s2602_s10 + $0x8] sm:$0xff] }
  0x27   :  { %1673 = vmatpush3.bf16.msra.mxu1 %v1672_v1  ;;  %v1713_v0 = vpack.c.bf16 %v685_v62, %v684_v61  ;;  %v687_v1 = vld [vmem:[%s2602_s10 + $0x18] sm:$0xff]  ;;  %v688_v3 = vld [vmem:[%s2602_s10 + $0x20] sm:$0xff] }
  0x28   :  { %1674 = vmatprep.subr.bf16.mxu1 %v1914_v4  ;;  %v1716_v2 = vpack.c.bf16 %v687_v1, %v686_v63  ;;  %v1719_v7 = vpack.c.bf16 %v689_v5, %v688_v3  ;;  %v692_v11 = vld [vmem:[%s2602_s10 + $0x40] sm:$0xff]  ;;  %v958_v5 = vld [vmem:[%s2606_s14 + $0x8] sm:$0xff] }
  0x29   :  { %1707 = vmatpush1.bf16.msra.mxu0 %v1706_v8  ;;  %v690_v8 = vld [vmem:[%s2602_s10 + $0x30] sm:$0xff]  ;;  %v1298_v62 = vld [vmem:[%s2605_s13] ss:$0 sm:$0xff] }
  0x2a   :  { %1709 = vmatprep.subr.bf16.mxu0 %v1708_v9  ;;  %v691_v9 = vld [vmem:[%s2602_s10 + $0x38] sm:$0xff]  ;;  %v957_v3 = vld [vmem:[%s2606_s14] sm:$0xff] }
  0x2b   :  { %1676 = vmatpush3.bf16.msra.mxu1 %v1675_v12  ;;  %v1722_v10 = vpack.c.bf16 %v691_v9, %v690_v8  ;;  %v693_v12 = vld [vmem:[%s2602_s10 + $0x48] sm:$0xff]  ;;  %v1761_v8 = vpack.c.bf16 %v958_v5, %v957_v3  ;;  %v960_v9 = vld [vmem:[%s2606_s14 + $0x18] sm:$0xff] }
  0x2c   :  { %1677 = vmatprep.subr.bf16.mxu1 %v1914_v4 }
  0x2d   :  { %1711 = vmatpush1.bf16.msra.mxu0 %v1710_v13  ;;  %v1725_v13 = vpack.c.bf16 %v693_v12, %v692_v11  ;;  %v961_v11 = vld [vmem:[%s2606_s14 + $0x20] sm:$0xff]  ;;  %v962_v12 = vld [vmem:[%s2606_s14 + $0x28] sm:$0xff] }
  0x2e   :  { %1712 = vmatprep.subr.bf16.mxu0 %v1914_v4 }
  0x2f   :  { %1679 = vmatpush3.bf16.msra.mxu1 %v1678_v17  ;;  %v1728_v17 = vpack.c.bf16 %v695_v16, %v694_v15  ;;  %v963_v15 = vld [vmem:[%s2606_s14 + $0x30] sm:$0xff]  ;;  %v964_v16 = vld [vmem:[%s2606_s14 + $0x38] sm:$0xff] }
  0x30   :  { %360 = vmatmul.mubr.f32.vlgmr.msra.gmra.mrb[0].mxu0 %v2191_v14  ;;  %1458 = vmatprep.subr.mxu1 %v1916_v6 }
  0x31   :  { %365 = vmatprep.mubr.f32.mxu0 %v1916_v6  ;;  %1714 = vmatpush3.bf16.msra.mxu0 %v1713_v0 }
  0x32   :  { %1715 = vmatprep.subr.bf16.mxu0 %v1914_v4 }
  0x34   :  { %366 = vmatmul.mubr.f32.gmra.mrb[2].mxu0 %v2205_v18 }
  0x35   :  { %1510 = vmatprep.mubr.msk.f32.mxu0 %vm1915_vm0, %v1916_v6  ;;  %1717 = vmatpush3.bf16.msra.mxu0 %v1716_v2 }
  0x36   :  { %1718 = vmatprep.subr.bf16.mxu0 %v1914_v4 }
  0x39   :  { %1720 = vmatpush3.bf16.msra.mxu0 %v1719_v7  ;;  %v959_v7 = vld [vmem:[%s2606_s14 + $0x10] sm:$0xff] }
  0x3a   :  { %1721 = vmatprep.subr.bf16.mxu0 %v1914_v4 }
  0x3d   :  { %1723 = vmatpush3.bf16.msra.mxu0 %v1722_v10  ;;  %v1764_v10 = vpack.c.bf16 %v960_v9, %v959_v7 }
  0x3e   :  { %1724 = vmatprep.subr.bf16.mxu0 %v1914_v4 }
  0x41   :  { %1726 = vmatpush3.bf16.msra.mxu0 %v1725_v13  ;;  %v1767_v13 = vpack.c.bf16 %v962_v12, %v961_v11 }
  0x42   :  { %1727 = vmatprep.subr.bf16.mxu0 %v1914_v4 }
  0x45   :  { %1729 = vmatpush3.bf16.msra.mxu0 %v1728_v17  ;;  %v1770_v17 = vpack.c.bf16 %v964_v16, %v963_v15 }
  0x46   :  { %1730 = vmatprep.subr.bf16.mxu0 %v1914_v4 }
  0xe5   :  { %v149_v25 = vpop.f32.mrb[0].mxu1 }
  0xe6   :  { %v150_v26 = vadd.f32 %v1292_v24, %v149_v25  ;;  %v1422_v27 = vpop.f32.mrb[1].mxu1  ;;  %v803_v24 = vld [vmem:[%s2604_s12] sm:$0xff]  ;;  %v804_v25 = vld [vmem:[%s2604_s12 + $0x8] sm:$0xff] }
  0xe7   :  { %v1737_v27 = vpack.c.bf16 %v804_v25, %v803_v24  ;;  %v968_v24 = vld [vmem:[%s2606_s14 + $0x58] sm:$0xff] }
  0xe8   :  { %1456 = vmatmul.mubr.f32.vlgmr.msra.gmra.mrb[2].mxu1 %v150_v26 }
  0xe9   :  { %1460 = vmatprep.mubr.msk.f32.mxu1 %vm1915_vm0, %v1916_v6 }
 0x103   :  { %v361_v30 = vpop.f32.mrb[0].mxu0 }
 0x104   :  { %v362_v31 = vadd.f32 %v361_v30, %v288_v29  ;;  %v363_v32 = vpop.f32.mrb[1].mxu0  ;;  %v806_v30 = vld [vmem:[%s2604_s12 + $0x18] sm:$0xff] }
 0x105   :  { %v364_v33 = vadd.f32 %v363_v32, %v292_v23  ;;  %v807_v32 = vld [vmem:[%s2604_s12 + $0x20] sm:$0xff] }
 0x106   :  { %1459 = vmatpush3.xpose.msra.mxu1 %v362_v31 }
 0x107   :  { %1463 = vmatprep.subr.mxu1 %v1916_v6  ;;  %v367_v34 = vpop.f32.mrb[2].mxu0 }
 0x108   :  { %v368_v35 = vadd.f32 %v367_v34, %v288_v29  ;;  %v369_v36 = vpop.f32.mrb[3].mxu0  ;;  %v805_v29 = vld [vmem:[%s2604_s12 + $0x10] sm:$0xff] }
 0x109   :  { %v2221_v37 = vadd.f32 %v369_v36, %v292_v23  ;;  %v1740_v31 = vpack.c.bf16 %v806_v30, %v805_v29  ;;  %v810_v36 = vld [vmem:[%s2604_s12 + $0x38] sm:$0xff]  ;;  %v971_v29 = vld [vmem:[%s2606_s14 + $0x70] sm:$0xff] }
 0x10a   :  { %v972_v30 = vld [vmem:[%s2606_s14 + $0x78] sm:$0xff] }
 0x1bb   :  { %v242_v39 = vpop.f32.mrb[2].mxu1 }
 0x1bc   :  { %v243_v40 = vadd.f32 %v1294_v38, %v242_v39  ;;  %v1457_v41 = vpop.f32.mrb[3].mxu1  ;;  %v811_v38 = vld [vmem:[%s2604_s12 + $0x40] sm:$0xff]  ;;  %v812_v39 = vld [vmem:[%s2604_s12 + $0x48] sm:$0xff] }
 0x1bd   :  { %v813_v41 = vld [vmem:[%s2604_s12 + $0x50] sm:$0xff] }
 0x1be   :  { %1461 = vmatmul.mubr.f32.vlgmr.msra.gmra.mrb[4].mxu1 %v243_v40  ;;  %v247_v42 = vcombine.high %v243_v40, %v243_v40  ;;  %v1749_v40 = vpack.c.bf16 %v812_v39, %v811_v38  ;;  %v1087_v38 = vld [vmem:[%s2608_s16 + $0xa0] sm:$0xff]  ;;  %v1088_v39 = vld [vmem:[%s2608_s16 + $0xa8] sm:$0xff] }
 0x1bf   :  { %1464 = vmatpush3.xpose.msra.mxu1 %v368_v35  ;;  %1465 = vmatprep.mubr.msk.f32.mxu1 %vm1915_vm0, %v1916_v6  ;;  %v809_v35 = vld [vmem:[%s2604_s12 + $0x30] sm:$0xff] }
 0x1c0   :  { %1468 = vmatprep.subr.mxu1 %v1916_v6 }
 0x1c2   :  { %1466 = vmatmul.mubr.f32.vlgmr.msra.gmra.mrb[6].mxu1 %v247_v42  ;;  %v814_v42 = vld [vmem:[%s2604_s12 + $0x58] sm:$0xff] }
 0x1c3   :  { %1469 = vmatpush3.msra.mxu1 %v364_v33  ;;  %1470 = vmatprep.mubr.msk.f32.mxu1 %vm1915_vm0, %v1916_v6  ;;  %v808_v33 = vld [vmem:[%s2604_s12 + $0x28] sm:$0xff] }
 0x1c4   :  { %1473 = vmatprep.subr.mxu1 %v1916_v6  ;;  %v1743_v34 = vpack.c.bf16 %v808_v33, %v807_v32  ;;  %v1083_v32 = vld [vmem:[%s2608_s16 + $0x80] sm:$0xff]  ;;  %v1084_v33 = vld [vmem:[%s2608_s16 + $0x88] sm:$0xff] }
 0x291   :  { %v438_v43 = vpop.f32.mrb[4].mxu1 }
 0x292   :  { %v512_v44 = vmul.f32 0.17677669, %v438_v43  ;;  %v1462_v45 = vpop.f32.mrb[5].mxu1  ;;  %v1752_v43 = vpack.c.bf16 %v814_v42, %v813_v41  ;;  %v1089_v41 = vld [vmem:[%s2608_s16 + $0xb0] sm:$0xff]  ;;  %v1090_v42 = vld [vmem:[%s2608_s16 + $0xb8] sm:$0xff] }
 0x293   :  { %v816_v45 = vld [vmem:[%s2604_s12 + $0x68] sm:$0xff] }
 0x294   :  { %v515_v46 = vsel %vm514_vm2, %v512_v44, -inf }
 0x295   :  { %516 = vmax.xlane.f32.xlu0 %v515_v46  ;;  %v508_v47 = vpop.f32.mrb[6].mxu1 }
 0x296   :  { %v513_v48 = vmul.f32 0.17677669, %v508_v47  ;;  %v1467_v49 = vpop.f32.mrb[7].mxu1  ;;  %v817_v47 = vld [vmem:[%s2604_s12 + $0x70] sm:$0xff] }
 0x298   :  { %v518_v50 = vsel %vm514_vm2, %v513_v48, -inf }
 0x299   :  { %519 = vmax.xlane.f32.xlu0 %v518_v50  ;;  %v802_v50 = vld [vmem:[%s2623_s21] sm:$0x3] }
 0x322   :  { %v517_v51 = vpop.xlane.xlu0 %516 }
 0x323   :  { %v521_v52 = vsub.f32 %v512_v44, %v517_v51  ;;  %v815_v44 = vld [vmem:[%s2604_s12 + $0x60] sm:$0xff] }
 0x324   :  { %v1755_v46 = vpack.c.bf16 %v816_v45, %v815_v44  ;;  %v696_v51 = vld [vmem:[%s2602_s10 + $0x60] sm:$0xff]  ;;  %v1092_v45 = vld [vmem:[%s2608_s16 + $0xc8] sm:$0xff] }
 0x325   :  { %v523_v53 = vmul.f32 1.442695, %v521_v52  ;;  %v697_v52 = vld [vmem:[%s2602_s10 + $0x68] sm:$0xff]  ;;  %v1091_v44 = vld [vmem:[%s2608_s16 + $0xc0] sm:$0xff] }
 0x326   :  { %v520_v54 = vpop.xlane.xlu0 %519 }
 0x327   :  { %1838 = vpow2.f32 %v523_v53  ;;  %v522_v55 = vsub.f32 %v513_v48, %v520_v54  ;;  %v818_v48 = vld [vmem:[%s2604_s12 + $0x78] sm:$0xff]  ;;  %v1731_v53 = vpack.c.bf16 %v697_v52, %v696_v51  ;;  %v698_v54 = vld [vmem:[%s2602_s10 + $0x70] sm:$0xff]  ;;  %v1096_v51 = vld [vmem:[%s2608_s16 + $0xe8] sm:$0xff] }
 0x328   :  { %v1758_v49 = vpack.c.bf16 %v818_v48, %v817_v47  ;;  %v1093_v47 = vld [vmem:[%s2608_s16 + $0xd0] sm:$0xff]  ;;  %v1094_v48 = vld [vmem:[%s2608_s16 + $0xd8] sm:$0xff] }
 0x329   :  { %v525_v56 = vmul.f32 1.442695, %v522_v55  ;;  %1732 = vmatpush3.bf16.msra.mxu0 %v1731_v53  ;;  %v699_v55 = vld [vmem:[%s2602_s10 + $0x78] sm:$0xff]  ;;  %v1101_v53 = vrot.slane %v2205_v18, 7 }
 0x32a   :  { %1733 = vmatprep.subr.bf16.mxu0 %v1914_v4 }
 0x32b   :  { %1840 = vpow2.f32 %v525_v56  ;;  %v1734_v56 = vpack.c.bf16 %v699_v55, %v698_v54  ;;  %v1097_v54 = vld [vmem:[%s2608_s16 + $0xf0] sm:$0xff]  ;;  %v1098_v55 = vld [vmem:[%s2608_s16 + $0xf8] sm:$0xff] }
 0x32d   :  { %1735 = vmatpush3.bf16.msra.mxu0 %v1734_v56  ;;  %v1806_v56 = vpack.c.bf16 %v1098_v55, %v1097_v54 }
 0x32e   :  { %1760 = vmatprep.subr.bf16.mxu0 %v1914_v4 }
 0x331   :  { %v1839_v57 = vpop.eup %1838 }
 0x332   :  { %v527_v58 = vsel %vm514_vm2, %v1839_v57, 0.0 }
 0x333   :  { %528 = vadd.xlane.f32.xlu1 %v527_v58 }
 0x335   :  { %v1841_v59 = vpop.eup %1840 }
 0x336   :  { %v530_v60 = vsel %vm514_vm2, %v1841_v59, 0.0 }
 0x337   :  { %531 = vadd.xlane.f32.xlu1 %v530_v60 }
 0x3c0   :  { %v529_v20 = vpop.xlane.xlu1 %528 }
 0x3c1   :  { %1842 = vrcp.f32 %v529_v20  ;;  %v965_v20 = vld [vmem:[%s2606_s14 + $0x40] sm:$0xff] }
 0x3c4   :  { %v532_v21 = vpop.xlane.xlu1 %531 }
 0x3c5   :  { %1844 = vrcp.f32 %v532_v21  ;;  %v966_v21 = vld [vmem:[%s2606_s14 + $0x48] sm:$0xff] }
 0x3cb   :  { %v1843_v22 = vpop.eup %1842 }
 0x3cc   :  { %v534_v23 = vmul.f32 %v1843_v22, %v1839_v57  ;;  %v1773_v22 = vpack.c.bf16 %v966_v21, %v965_v20  ;;  %v1067_v20 = vld [vmem:[%s2608_s16] sm:$0xff]  ;;  %v1068_v21 = vld [vmem:[%s2608_s16 + $0x8] sm:$0xff] }
 0x3ce   :  { %1471 = vmatmul.mubr.msk.f32.vlgmr.msra.gmra.mrb[8].mxu1 %vm537_vm3, %v534_v23  ;;  %v967_v23 = vld [vmem:[%s2606_s14 + $0x50] sm:$0xff] }
 0x3cf   :  { %v1845_v26 = vpop.eup %1844  ;;  %1474 = vmatpush3.msra.mxu1 %v2221_v37  ;;  %1475 = vmatprep.mubr.msk.f32.mxu1 %vm1915_vm0, %v1916_v6  ;;  %v1746_v37 = vpack.c.bf16 %v810_v36, %v809_v35  ;;  %v1776_v25 = vpack.c.bf16 %v968_v24, %v967_v23  ;;  %v1085_v35 = vld [vmem:[%s2608_s16 + $0x90] sm:$0xff]  ;;  %v1086_v36 = vld [vmem:[%s2608_s16 + $0x98] sm:$0xff] }
 0x3d0   :  { %v536_v28 = vmul.f32 %v1845_v26, %v1841_v59  ;;  %1736 = vmatprep.subr.bf16.mxu1 %v1914_v4  ;;  %v969_v26 = vld [vmem:[%s2606_s14 + $0x60] sm:$0xff] }
 0x3d2   :  { %1476 = vmatmul.mubr.msk.f32.vlgmr.msra.gmra.mrb[10].mxu1 %vm537_vm3, %v536_v28 }
 0x3d3   :  { %1738 = vmatpush3.bf16.msra.mxu1 %v1737_v27  ;;  %1545 = vmatprep.mubr.msk.f32.mxu1 %vm1915_vm0, %v1916_v6  ;;  %v970_v27 = vld [vmem:[%s2606_s14 + $0x68] sm:$0xff] }
 0x3d4   :  { %1739 = vmatprep.subr.bf16.mxu1 %v1914_v4  ;;  %v1779_v28 = vpack.c.bf16 %v970_v27, %v969_v26  ;;  %v1069_v26 = vld [vmem:[%s2608_s16 + $0x10] sm:$0xff]  ;;  %v1070_v27 = vld [vmem:[%s2608_s16 + $0x18] sm:$0xff] }
 0x3d7   :  { %1741 = vmatpush3.bf16.msra.mxu1 %v1740_v31  ;;  %v1782_v31 = vpack.c.bf16 %v972_v30, %v971_v29  ;;  %v1812_v29 = vpack.c.bf16 %v1070_v27, %v1069_v26  ;;  %v1071_v30 = vld [vmem:[%s2608_s16 + $0x20] sm:$0xff] }
 0x3d8   :  { %1742 = vmatprep.subr.bf16.mxu1 %v1914_v4 }
 0x3db   :  { %1744 = vmatpush3.bf16.msra.mxu1 %v1743_v34  ;;  %v1785_v34 = vpack.c.bf16 %v1084_v33, %v1083_v32  ;;  %v1073_v33 = vld [vmem:[%s2608_s16 + $0x30] sm:$0xff] }
 0x3dc   :  { %1745 = vmatprep.subr.bf16.mxu1 %v1914_v4 }
 0x3df   :  { %1747 = vmatpush3.bf16.msra.mxu1 %v1746_v37  ;;  %v1788_v37 = vpack.c.bf16 %v1086_v36, %v1085_v35  ;;  %v1075_v36 = vld [vmem:[%s2608_s16 + $0x40] sm:$0xff] }
 0x3e0   :  { %1748 = vmatprep.subr.bf16.mxu1 %v1914_v4 }
 0x3e3   :  { %1750 = vmatpush3.bf16.msra.mxu1 %v1749_v40  ;;  %v1791_v40 = vpack.c.bf16 %v1088_v39, %v1087_v38  ;;  %v1077_v39 = vld [vmem:[%s2608_s16 + $0x50] sm:$0xff] }
 0x3e4   :  { %1751 = vmatprep.subr.bf16.mxu1 %v1914_v4 }
 0x3e7   :  { %1753 = vmatpush3.bf16.msra.mxu1 %v1752_v43  ;;  %v1794_v43 = vpack.c.bf16 %v1090_v42, %v1089_v41  ;;  %v1079_v42 = vld [vmem:[%s2608_s16 + $0x60] sm:$0xff] }
 0x3e8   :  { %1754 = vmatprep.subr.bf16.mxu1 %v1914_v4 }
 0x3eb   :  { %1756 = vmatpush3.bf16.msra.mxu1 %v1755_v46  ;;  %v1797_v46 = vpack.c.bf16 %v1092_v45, %v1091_v44  ;;  %v1081_v45 = vld [vmem:[%s2608_s16 + $0x70] sm:$0xff] }
 0x3ec   :  { %1757 = vmatprep.subr.bf16.mxu1 %v1914_v4 }
 0x3ef   :  { %1759 = vmatpush3.bf16.msra.mxu1 %v1758_v49  ;;  %v1800_v49 = vpack.c.bf16 %v1094_v48, %v1093_v47  ;;  %v908_v48 = vld [vmem:[%s2624_s2] sm:$0x3] }
 0x3f0   :  { %1784 = vmatprep.subr.bf16.mxu1 %v1914_v4 }
 0x3f2   :  { %1546 = vmatmul.mubr.f32.vlgmr.msra.gmra.mrb[12].mxu1 %v802_v50  ;;  %v1095_v50 = vld [vmem:[%s2608_s16 + $0xe0] sm:$0xff] }
 0x3f3   :  { %1615 = vmatprep.mubr.msk.f32.mxu1 %vm1915_vm0, %v1916_v6  ;;  %1786 = vmatpush3.bf16.msra.mxu1 %v1785_v34  ;;  %v1803_v52 = vpack.c.bf16 %v1096_v51, %v1095_v50  ;;  %v1074_v34 = vld [vmem:[%s2608_s16 + $0x38] sm:$0xff] }
 0x3f4   :  { %1787 = vmatprep.subr.bf16.mxu1 %v1914_v4  ;;  %v1818_v35 = vpack.c.bf16 %v1074_v34, %v1073_v33 }
 0x3f7   :  { %1789 = vmatpush3.bf16.msra.mxu1 %v1788_v37  ;;  %v1076_v37 = vld [vmem:[%s2608_s16 + $0x48] sm:$0xff] }
 0x3f8   :  { %1790 = vmatprep.subr.bf16.mxu1 %v1914_v4  ;;  %v1821_v38 = vpack.c.bf16 %v1076_v37, %v1075_v36 }
 0x3fb   :  { %1792 = vmatpush3.bf16.msra.mxu1 %v1791_v40  ;;  %v1078_v40 = vld [vmem:[%s2608_s16 + $0x58] sm:$0xff] }
 0x3fc   :  { %1793 = vmatprep.subr.bf16.mxu1 %v1914_v4  ;;  %v1824_v41 = vpack.c.bf16 %v1078_v40, %v1077_v39 }
 0x3ff   :  { %1795 = vmatpush3.bf16.msra.mxu1 %v1794_v43  ;;  %v1080_v43 = vld [vmem:[%s2608_s16 + $0x68] sm:$0xff] }
 0x400   :  { %1796 = vmatprep.subr.bf16.mxu1 %v1914_v4  ;;  %v1827_v44 = vpack.c.bf16 %v1080_v43, %v1079_v42 }
 0x403   :  { %1798 = vmatpush3.bf16.msra.mxu1 %v1797_v46  ;;  %v1082_v46 = vld [vmem:[%s2608_s16 + $0x78] sm:$0xff] }
 0x404   :  { %1799 = vmatprep.subr.bf16.mxu1 %v1914_v4  ;;  %v1830_v47 = vpack.c.bf16 %v1082_v46, %v1081_v45 }
 0x407   :  { %1801 = vmatpush3.bf16.msra.mxu1 %v1800_v49  ;;  %v909_v49 = vadd.f32 1e-20, %v908_v48 }
 0x408   :  { %1802 = vmatprep.subr.bf16.mxu1 %v1914_v4 }
 0x40b   :  { %1804 = vmatpush3.bf16.msra.mxu1 %v1803_v52 }
 0x40c   :  { %1805 = vmatprep.subr.bf16.mxu1 %v1914_v4 }
 0x40f   :  { %1807 = vmatpush3.bf16.msra.mxu1 %v1806_v56 }
 0x4a1   :  { %v607_v57 = vpop.f32.mrb[8].mxu1 }
 0x4a2   :  { %v1472_v58 = vpop.f32.mrb[9].mxu1 }
 0x4a5   :  { %v680_v59 = vpop.f32.mrb[10].mxu1 }
 0x4a6   :  { %v709_v60 = vcombine.low %v607_v57, %v680_v59  ;;  %v1477_v61 = vpop.f32.mrb[11].mxu1  ;;  %v1102_v57 = vsel %vm982_vm5, %v1101_v53, %v2191_v14 }
 0x4a7   :  { %1616 = vmatmul.mubr.f32.vlgmr.msra.gmra.mrb[14].mxu1 %v1102_v57 }
 0x4a8   :  { %1511 = vmatmul.mubr.f32.vlgmr.msra.gmra.mrb[4].mxu0 %v709_v60 }
 0x4a9   :  { %1580 = vmatprep.mubr.msk.f32.mxu0 %vm1915_vm0, %v1916_v6  ;;  %1762 = vmatpush3.bf16.msra.mxu0 %v1761_v8 }
 0x4aa   :  { %1763 = vmatprep.subr.bf16.mxu0 %v1914_v4 }
 0x4ad   :  { %1765 = vmatpush3.bf16.msra.mxu0 %v1764_v10 }
 0x4ae   :  { %1766 = vmatprep.subr.bf16.mxu0 %v1914_v4 }
 0x4b1   :  { %1768 = vmatpush3.bf16.msra.mxu0 %v1767_v13 }
 0x4b2   :  { %1769 = vmatprep.subr.bf16.mxu0 %v1914_v4 }
 0x4b5   :  { %1771 = vmatpush3.bf16.msra.mxu0 %v1770_v17 }
 0x4b6   :  { %1772 = vmatprep.subr.bf16.mxu0 %v1914_v4 }
 0x4b9   :  { %1774 = vmatpush3.bf16.msra.mxu0 %v1773_v22 }
 0x4ba   :  { %1775 = vmatprep.subr.bf16.mxu0 %v1914_v4 }
 0x4bd   :  { %1777 = vmatpush3.bf16.msra.mxu0 %v1776_v25  ;;  %v1809_v25 = vpack.c.bf16 %v1068_v21, %v1067_v20 }
 0x4be   :  { %1778 = vmatprep.subr.bf16.mxu0 %v1914_v4 }
 0x4c1   :  { %1780 = vmatpush3.bf16.msra.mxu0 %v1779_v28 }
 0x4c2   :  { %1781 = vmatprep.subr.bf16.mxu0 %v1914_v4 }
 0x4c5   :  { %v892_v63 = vpop.f32.mrb[12].mxu1  ;;  %1783 = vmatpush3.bf16.msra.mxu0 %v1782_v31  ;;  %v1072_v31 = vld [vmem:[%s2608_s16 + $0x28] sm:$0xff] }
 0x4c6   :  { %v2364_v0 = vadd.f32 %v1298_v62, %v892_v63  ;;  %v1547_v1 = vpop.f32.mrb[13].mxu1  ;;  %1808 = vmatprep.subr.bf16.mxu0 %v1914_v4  ;;  %v1297_v62 = vld [vmem:[%s2603_s11] ss:$0 sm:$0xff]  ;;  %v1815_v32 = vpack.c.bf16 %v1072_v31, %v1071_v30  ;;  %v930_v30 = vand.u32 127, %v285_v19 }
 0x4c8   :  { %v897_v2 = vsel %vm896_vm4, %v2364_v0, -inf }
 0x4c9   :  { %898 = vmax.xlane.f32.xlu0 %v897_v2 }
 0x556   :  { %v899_v58 = vpop.xlane.xlu0 %898 }
 0x557   :  { %v900_v18 = vsub.f32 %v2364_v0, %v899_v58 }
 0x559   :  { %v901_v59 = vmul.f32 1.442695, %v900_v18 }
 0x55b   :  { %1846 = vpow2.f32 %v901_v59 }
 0x55c   :  { %1848 = vlog2.f32 %v909_v49 }
 0x565   :  { %v2483_v60 = vpop.eup %1846 }
 0x566   :  { %v903_v61 = vsel %vm896_vm4, %v2483_v60, 0.0  ;;  %v1849_v50 = vpop.eup %1848 }
 0x567   :  { %904 = vadd.xlane.f32.xlu1 %v903_v61  ;;  %v911_v51 = vmul.f32 0.6931472, %v1849_v50 }
 0x569   :  { %v912_v52 = vsub.f32 0.0, %v911_v51 }
 0x56b   :  { %v913_v53 = vadd.f32 1e-20, %v912_v52 }
 0x56d   :  { %1850 = vlog2.f32 %v913_v53 }
 0x577   :  { %v1851_v55 = vpop.eup %1850 }
 0x578   :  { %v915_v56 = vmul.f32 0.6931472, %v1851_v55 }
 0x57a   :  { %v916_v57 = vsub.f32 0.0, %v915_v56  ;;  %v1170_v59 = vpop.f32.mrb[14].mxu1 }
 0x57b   :  { %v777_v63 = vpop.f32.mrb[4].mxu0 }
 0x57c   :  { %v778_v1 = vadd.f32 %v1297_v62, %v777_v63  ;;  %v1512_v14 = vpop.f32.mrb[5].mxu0  ;;  %v1617_v62 = vpop.f32.mrb[15].mxu1 }
 0x57e   :  { %v782_v2 = vcombine.high %v778_v1, %v778_v1  ;;  %v785_v3 = vsel %vm784_vm6, %v778_v1, 0.0 }
 0x57f   :  { %v786_v5 = vrot.slane %v785_v3, 4 }
 0x580   :  { %v792_v0 = vsel %vm784_vm6, %v782_v2, 0.0  ;;  %v1301_v2 = vld [vmem:[#allocation2] ss:$0 sm:$0xff] }
 0x581   :  { %v787_v7 = vadd.f32 %v786_v5, %v785_v3  ;;  %v793_v8 = vrot.slane %v792_v0, 4 }
 0x583   :  { %v788_v9 = vrot.slane %v787_v7, 2  ;;  %v794_v10 = vadd.f32 %v793_v8, %v792_v0 }
 0x585   :  { %v789_v11 = vadd.f32 %v788_v9, %v787_v7  ;;  %v795_v12 = vrot.slane %v794_v10, 2 }
 0x587   :  { %v790_v13 = vrot.slane %v789_v11, 1  ;;  %v796_v15 = vadd.f32 %v795_v12, %v794_v10  ;;  %v1300_v12 = vld [vmem:[%s2607_s15] ss:$0 sm:$0xff]  ;;  %s1917_s15 = smov [#allocation5]  }
 0x589   :  { %v791_v16 = vadd.f32 %v790_v13, %v789_v11  ;;  %v797_v17 = vrot.slane %v796_v15, 1 }
 0x58b   :  { %v798_v22 = vadd.f32 %v797_v17, %v796_v15  ;;  %v800_v23 = vmul.f32 0.25, %v791_v16 }
 0x58d   :  { %v801_v24 = vmul.f32 0.25, %v798_v22 }
 0x58f   :  { %v983_v28 = vsel %vm982_vm5, %v801_v24, %v800_v23 }
 0x590   :  { %1581 = vmatmul.mubr.f32.vlgmr.msra.gmra.mrb[6].mxu0 %v983_v28 }
 0x591   :  { %1810 = vmatpush3.bf16.msra.mxu0 %v1809_v25  ;;  %1650 = vmatprep.mubr.msk.f32.mxu0 %vm1915_vm0, %v1916_v6 }
 0x592   :  { %1811 = vmatprep.subr.bf16.mxu0 %v1914_v4 }
 0x595   :  { %1813 = vmatpush3.bf16.msra.mxu0 %v1812_v29 }
 0x596   :  { %1814 = vmatprep.subr.bf16.mxu0 %v1914_v4 }
 0x599   :  { %1816 = vmatpush3.bf16.msra.mxu0 %v1815_v32 }
 0x59a   :  { %1817 = vmatprep.subr.bf16.mxu0 %v1914_v4 }
 0x59d   :  { %1819 = vmatpush3.bf16.msra.mxu0 %v1818_v35 }
 0x59e   :  { %1820 = vmatprep.subr.bf16.mxu0 %v1914_v4 }
 0x5a1   :  { %1822 = vmatpush3.bf16.msra.mxu0 %v1821_v38 }
 0x5a2   :  { %1823 = vmatprep.subr.bf16.mxu0 %v1914_v4 }
 0x5a5   :  { %1825 = vmatpush3.bf16.msra.mxu0 %v1824_v41 }
 0x5a6   :  { %1826 = vmatprep.subr.bf16.mxu0 %v1914_v4 }
 0x5a9   :  { %1828 = vmatpush3.bf16.msra.mxu0 %v1827_v44 }
 0x5aa   :  { %1829 = vmatprep.subr.bf16.mxu0 %v1914_v4 }
 0x5ad   :  { %1831 = vmatpush3.bf16.msra.mxu0 %v1830_v47 }
 0x5b0   :  { %1651 = vmatmul.mubr.f32.vlgmr.msra.gmra.mrb[8].mxu0 %v983_v28 }
 0x5f4   :  { %v905_v54 = vpop.xlane.xlu1 %904 }
 0x5f5   :  { %1852 = vrcp.f32 %v905_v54 }
 0x5ff   :  { %v1853_v58 = vpop.eup %1852 }
 0x600   :  { %v907_v4 = vmul.f32 %v1853_v58, %v2483_v60 }
 0x602   :  { %v917_v18 = vadd.f32 %v916_v57, %v907_v4 }
 0x604   :  { %v918_v61 = vsel %vm896_vm4, %v917_v18, -inf }
 0x605   :  { %919 = vmax.xlane.f32.xlu0 %v918_v61 }
 0x663   :  { %v1051_v63 = vpop.f32.mrb[6].mxu0 }
 0x664   :  { %v1582_v1 = vpop.f32.mrb[7].mxu0  ;;  %v1052_v16 = vadd.f32 %v1300_v12, %v1051_v63 }
 0x666   :  { %v1055_v20 = vsel %vm896_vm4, %v1052_v16, -inf }
 0x683   :  { %v1240_v14 = vpop.f32.mrb[8].mxu0 }
 0x684   :  { %v1241_v3 = vadd.f32 %v1240_v14, %v1170_v59  ;;  %v1652_v5 = vpop.f32.mrb[9].mxu0 }
 0x686   :  { %v1251_v0 = vadd.f32 %v1301_v2, %v1241_v3 }
 0x688   :  { %v1302_v7 = vmul.f32 -1.442695, %v1251_v0 }
 0x68a   :  { %1854 = vpow2.f32 %v1302_v7 }
 0x692   :  { %v920_v8 = vpop.xlane.xlu0 %919 }
 0x693   :  { %v921_v9 = vsub.f32 %v917_v18, %v920_v8 }
 0x694   :  { %v1855_v10 = vpop.eup %1854 }
 0x695   :  { %v1255_v11 = vadd.f32 1.0, %v1855_v10  ;;  %v922_v60 = vmul.f32 1.442695, %v921_v9 }
 0x697   :  { %1856 = vrcp.f32 %v1255_v11 }
 0x698   :  { %1858 = vpow2.f32 %v922_v60 }
 0x6a1   :  { %v1857_v13 = vpop.eup %1856 }
 0x6a2   :  { %v1859_v15 = vpop.eup %1858  ;;  %1259 = vst.msk [vmem:[%s2610_s18] sm:$0x3] %vm1258_vm7, %v1857_v13  ;;  %s1278_s18 = sshll.u32 %s1917_s15, 4  ;;  %s1279_s18 = int_to_ptr.vmem [resolvable:$true] %s1278_s18 }
 0x6a3   :  { %v924_v17 = vsel %vm896_vm4, %v1859_v15, 0.0  ;;  %s1866_s26 = scalar_lea.vmem %s1279_s18, 32  ;;  %p1871_p1 = scmp.lt.s32.totalorder %s1279_s18, %s1279_s18 }
 0x6a4   :  { %925 = vadd.xlane.f32.xlu1 %v924_v17  ;;  %p1867_p0 = scmp.ne.s32.totalorder %s1279_s18, %s1866_s26  ;;  %p1872_p2 = scmp.lt.s32.totalorder %s1866_s26, %s1866_s26 }
 0x6a6   :  { %p1873_p3 = por %p1872_p2, %p1871_p1 }
 0x6a8   :  { %1056 = vmax.xlane.f32.xlu1 %v1055_v20  ;;  %p1874_p4 = pnand %p1873_p3, %p1867_p0 }
 0x731   :  { %v926_v21 = vpop.xlane.xlu1 %925 }
 0x732   :  { %1860 = vrcp.f32 %v926_v21 }
 0x735   :  { %v1057_v22 = vpop.xlane.xlu1 %1056 }
 0x736   :  { %v1058_v23 = vsub.f32 %v1052_v16, %v1057_v22 }
 0x738   :  { %v1059_v24 = vmul.f32 1.442695, %v1058_v23 }
 0x73a   :  { %1862 = vpow2.f32 %v1059_v24 }
 0x73c   :  { %v1861_v25 = vpop.eup %1860 }
 0x73d   :  { %v928_v26 = vmul.f32 %v1861_v25, %v1859_v15 }
 0x73f   :  { %v931_v27 = vsel %vm896_vm4, %v928_v26, -inf }
 0x740   :  { %932 = vmax.xlane.f32.xlu0 %v931_v27 }
 0x744   :  { %v1863_v28 = vpop.eup %1862 }
 0x745   :  { %v1061_v29 = vsel %vm896_vm4, %v1863_v28, 0.0 }
 0x746   :  { %1062 = vadd.xlane.f32.xlu1 %v1061_v29 }
 0x7cd   :  { %v933_v31 = vpop.xlane.xlu0 %932 }
 0x7ce   :  { %vm934_vm8 = vcmp.eq.f32.partialorder %v928_v26, %v933_v31 }
 0x7cf   :  { %v935_v32 = vsel %vm934_vm8, %v930_v30, 4 }
 0x7d0   :  { %v936_v33 = vsel %vm896_vm4, %v935_v32, 2147483647 }
 0x7d1   :  { %v938_v34 = vshra.s32 %v936_v33, 16  ;;  %v937_v39 = vand.u32 65535, %v936_v33 }
 0x7d3   :  { %v1063_v35 = vpop.xlane.xlu1 %1062  ;;  %v940_v36 = vcvt.s32.f32 %v938_v34  ;;  %v939_v41 = vcvt.s32.f32 %v937_v39 }
 0x7d4   :  { %1864 = vrcp.f32 %v1063_v35 }
 0x7d5   :  { %941 = vmin.xlane.f32.xlu0 %v940_v36 }
 0x7de   :  { %v1865_v37 = vpop.eup %1864 }
 0x7df   :  { %v1065_v38 = vmul.f32 %v1865_v37, %v1863_v28 }
 0x7e1   :  { %1066 = vst.msk [vmem:[#allocation5] sm:$0x3] %vm896_vm4, %v1065_v38 }
 0x862   :  { %v942_v40 = vpop.xlane.xlu0 %941 }
 0x863   :  { %vm943_vm9 = vcmp.eq.f32.partialorder %v940_v36, %v942_v40 }
 0x864   :  { %v944_v42 = vsel %vm943_vm9, %v939_v41, inf }
 0x865   :  { %945 = vmin.xlane.f32.xlu0 %v944_v42 }
 0x866   :  { %1877 = shalt.err (!%p1874_p4)
}
 0x867   :  { %s1878_s13 = scalar_lea.hbm %s2612_s20, 32 }
 0x868   :  { %p1879_p5 = scmp.ne.s32.totalorder %s2612_s20, %s1878_s13  ;;  %p1882_p6 = scmp.lt.u32.totalorder %s1878_s13, %s2612_s20 }
 0x86a   :  { %p1884_p7 = pnand %p1882_p6, %p1879_p5 }
 0x86c   :  { %1887 = shalt.err (!%p1884_p7)
}
 0x86d   :  { %1281 = dma.vmem_to_hbm [thread:$0]  %s1279_s18, 32, %s2612_s20, [#allocation6]   ;;  %v948_v19 = vcvt.f32.s32 %v942_v40 }
 0x86e   :  { %s1918_s14 = smov [#allocation3]  }
 0x86f   :  { %v949_v44 = vshll.u32 %v948_v19, 16  ;;  %s1268_s21 = sshll.u32 %s1918_s14, 4  ;;  %s1269_s21 = int_to_ptr.vmem [resolvable:$true] %s1268_s21 }
 0x870   :  { %s1888_s6 = scalar_lea.vmem %s1269_s21, 32  ;;  %p1893_p9 = scmp.lt.s32.totalorder %s1269_s21, %s1269_s21 }
 0x871   :  { %p1889_p8 = scmp.ne.s32.totalorder %s1269_s21, %s1888_s6  ;;  %p1894_p10 = scmp.lt.s32.totalorder %s1888_s6, %s1888_s6 }
 0x873   :  { %p1895_p11 = por %p1894_p10, %p1893_p9 }
 0x875   :  { %p1896_p12 = pnand %p1895_p11, %p1889_p8 }
 0x8f2   :  { %v946_v43 = vpop.xlane.xlu0 %945 }
 0x8f3   :  { %v947_v45 = vcvt.f32.s32 %v946_v43 }
 0x8f5   :  { %v950_v46 = vadd.s32 %v949_v44, %v947_v45 }
 0x8f7   :  { %vm951_vm10 = vcmp.eq.s32.totalorder %v930_v30, %v950_v46 }
 0x8f8   :  { %v1299_v47 = vsel %vm951_vm10, 1.0, %v1916_v6 }
 0x8f9   :  { %v954_v48 = vsub.f32 %v1299_v47, %v928_v26 }
 0x8fb   :  { %v955_v49 = vadd.f32 %v954_v48, %v928_v26 }
 0x8fd   :  { %956 = vst.msk [vmem:[#allocation3] sm:$0x3] %vm896_vm4, %v955_v49 }
 0x8fe   :  { %1899 = shalt.err (!%p1896_p12)
}
 0x8ff   :  { %s1900_s12 = scalar_lea.hbm %s2611_s19, 32 }
 0x900   :  { %p1901_p13 = scmp.ne.s32.totalorder %s2611_s19, %s1900_s12  ;;  %p1904_p0 = scmp.lt.u32.totalorder %s1900_s12, %s2611_s19 }
 0x902   :  { %p1906_p1 = pnand %p1904_p0, %p1901_p13 }
 0x904   :  { %1909 = shalt.err (!%p1906_p1)
}
 0x905   :  { %1271 = dma.vmem_to_hbm [thread:$0]  %s1269_s21, 32, %s2611_s19, [#allocation4]  }
 0x906   :  { %1910 = dma.done.wait [#allocation4], 32  }
 0x907   :  { %1911 = vsyncadd [#allocation4], 4294967264 }
 0x908   :  { %1912 = dma.done.wait [#allocation6], 32  }
 0x909   :  { %1913 = vsyncadd [#allocation6], 4294967264 }
 0x90a   :  { %1290 = vsyncpa [#allocation4], 1 }
 0x90b   :  { %1291 = vsyncpa [#allocation6], 1 }

// kernel: forward.2
= control target key start
LH: loop header
LB: loop body
LE: loop exit
PB: predicated region body
PF: predicated region fallthrough
CT: control target
= control target key end

     0   :  { %s2730_s0 = inlined_call_operand.vmem [shape: f32[2,2,8,128], index: 0, kind: input, shape index: {}]   ;;  %s2731_s1 = inlined_call_operand.vmem [shape: f32[2,2,8], index: 1, kind: input, shape index: {}]   ;;  %s2732_s2 = inlined_call_operand.vmem [shape: f32[1,128], index: 2, kind: input, shape index: {}, may-alias: {2,8,14}]   ;;  %s2733_s3 = inlined_call_operand.vmem [shape: f32[1,128], index: 3, kind: input, shape index: {}, may-alias: {3,7,9,11,13,15}]   ;;  %s2734_s4 = inlined_call_operand.vmem [shape: f32[128,384], index: 4, kind: input, shape index: {}]   ;;  %s2735_s5 = inlined_call_operand.vmem [shape: f32[1,384], index: 5, kind: input, shape index: {}]   ;;  %s2736_s6 = inlined_call_operand.vmem [shape: f32[128,128], index: 6, kind: input, shape index: {}]   ;;  %s2737_s7 = inlined_call_operand.vmem [shape: f32[1,128], index: 7, kind: input, shape index: {}, may-alias: {3,7,9,11,13,15}]   ;;  %s2738_s8 = inlined_call_operand.vmem [shape: f32[1,128], index: 8, kind: input, shape index: {}, may-alias: {2,8,14}]   ;;  %s2739_s9 = inlined_call_operand.vmem [shape: f32[1,128], index: 9, kind: input, shape index: {}, may-alias: {3,7,9,11,13,15}]   ;;  %s2740_s10 = inlined_call_operand.hbm [shape: f32[128,128], index: 10, kind: input, shape index: {}]   ;;  %s2741_s11 = inlined_call_operand.vmem [shape: f32[1,128], index: 11, kind: input, shape index: {}, may-alias: {3,7,9,11,13,15}]   ;;  %s2742_s12 = inlined_call_operand.hbm [shape: f32[128,128], index: 12, kind: input, shape index: {}]   ;;  %s2743_s13 = inlined_call_operand.vmem [shape: f32[1,128], index: 13, kind: input, shape index: {}, may-alias: {3,7,9,11,13,15}]   ;;  %s2744_s14 = inlined_call_operand.vmem [shape: f32[1,128], index: 14, kind: input, shape index: {}, may-alias: {2,8,14}]   ;;  %s2745_s15 = inlined_call_operand.vmem [shape: f32[1,128], index: 15, kind: input, shape index: {}, may-alias: {3,7,9,11,13,15}]   ;;  %s2746_s16 = inlined_call_operand.vmem [shape: f32[2,2,8,128], index: 16, kind: output, shape index: {}]  }
   0x1   :  { %2750 = sst [smem:[#allocation9_spill]] %s2730_s0 }
   0x2   :  { %2751 = sst [smem:[#allocation10_spill]] %s2746_s16 }
   0x3   :  { %21 = vsyncpa [#allocation3], 0 }
   0x4   :  { %22 = vsyncpa [#allocation5], 0  ;;  %s2338_s21 = smov 0  }
   0x5 LB: > { %2752 = sst [smem:[#allocation8_spill]] %s2244_s21  ;;  %s2344_s22 = sadd.s32 4294967295, %s2244_s21   ;;  %s2244_s21 = sphi %s2338_s21, %s28_s21  }
   0x6   : > { %p1688_p0 = scmp.ge.s32.totalorder %s2244_s21, 1  ;;  %p405_p1 = scmp.lt.s32.totalorder %s2244_s21, 3 }
   0x7   : > { %s2246_s23 = smov [#allocation2]   ;;  %p2747_p3 = scmp.eq.s32.totalorder %s2344_s22, 0 }
   0x8   : > { %s441_s24 = sshll.u32 %s2246_s23, 4  ;;  %p2348_p2 = pnand %p1688_p0, %p405_p1  ;;  %s442_s24 = int_to_ptr.vmem [resolvable:$true] %s441_s24 }
   0x9   : > { %s2247_s26 = smov [#allocation4]   ;;  %s2174_s0 = scalar_lea.hbm %s2740_s10, 2048 }
   0xa   : > { %s2753_s25 = scalar_select %p2348_p2, 1, 0 }
   0xb   : > { %p2124_p4 = pneg %p2348_p2  ;;  %s457_s27 = sshll.u32 %s2247_s26, 4  ;;  %s2361_s27 = int_to_ptr.vmem [resolvable:$true] %s457_s27 }
   0xc   : > { %p2175_p6 = scmp.ne.s32.totalorder %s2740_s10, %s2174_s0  ;;  %p2181_p10 = scmp.lt.u32.totalorder %s2174_s0, %s2740_s10 }
   0xd   : > { %p2357_p5 = pnand %p2747_p3, %p2124_p4 }
   0xf   : > { %p2176_p7 = pneg %p2357_p5 }
  0x11   : > { %p2177_p8 = pnand %p2176_p7, %p2175_p6 }
  0x13   : > { %p2178_p9 = pneg %p2177_p8 }
  0x15   : > { %p2183_p11 = pnand %p2181_p10, %p2178_p9 }
  0x17   : > { %2186 = shalt.err (!%p2183_p11)
}
  0x18   : > { %s2187_s23 = scalar_lea.vmem %s442_s24, 2048  ;;  %p2195_p1 = scmp.lt.s32.totalorder %s442_s24, %s442_s24 }
  0x19   : > { %p2188_p12 = scmp.ne.s32.totalorder %s442_s24, %s2187_s23  ;;  %p2196_p4 = scmp.lt.s32.totalorder %s2187_s23, %s2187_s23 }
  0x1b   : > { %p2190_p13 = pnand %p2188_p12, %p2176_p7  ;;  %p2197_p3 = por %p2196_p4, %p2195_p1 }
  0x1d   : > { %p2191_p0 = pneg %p2190_p13 }
  0x1f   : > { %p2198_p2 = pnand %p2197_p3, %p2191_p0 }
  0x21   : > { %2201 = shalt.err (!%p2198_p2)
}
  0x22   : > { %s2248_s26 = smov 128   ;;  %s2249_s29 = smov 8  }
  0x23   : > { %2127 = dma.hbm_to_vmem [thread:$0]  (!%p2357_p5), %s2740_s10, 2048, %s442_s24, [#allocation3], %s2248_s26, %s2248_s26, %s2249_s29  }
  0x24   : > { %s2202_s19 = scalar_lea.hbm %s2742_s12, 2048 }
  0x25   : > { %p2203_p6 = scmp.ne.s32.totalorder %s2742_s12, %s2202_s19  ;;  %p2209_p8 = scmp.lt.u32.totalorder %s2202_s19, %s2742_s12 }
  0x27   : > { %p2205_p2 = pnand %p2203_p6, %p2176_p7 }
  0x29   : > { %p2206_p3 = pneg %p2205_p2 }
  0x2b   : > { %p2211_p9 = pnand %p2209_p8, %p2206_p3 }
  0x2d   : > { %2214 = shalt.err (!%p2211_p9)
}
  0x2e   : > { %s2215_s24 = scalar_lea.vmem %s2361_s27, 2048  ;;  %p2223_p13 = scmp.lt.s32.totalorder %s2361_s27, %s2361_s27 }
  0x2f   : > { %p2216_p10 = scmp.ne.s32.totalorder %s2361_s27, %s2215_s24  ;;  %p2224_p0 = scmp.lt.s32.totalorder %s2215_s24, %s2215_s24 }
  0x31   : > { %p2218_p11 = pnand %p2216_p10, %p2176_p7  ;;  %p2225_p1 = por %p2224_p0, %p2223_p13 }
  0x33   : > { %p2219_p12 = pneg %p2218_p11 }
  0x35   : > { %p2226_p4 = pnand %p2225_p1, %p2219_p12 }
  0x37   : > { %2229 = shalt.err (!%p2226_p4)
}
  0x38   : > { %2130 = dma.hbm_to_vmem [thread:$0]  (!%p2357_p5), %s2742_s12, 2048, %s2361_s27, [#allocation5], %s2248_s26, %s2248_s26, %s2249_s29  }
  0x39   : > { %p2755_p6 = scmp.ne.s32.totalorder %s2753_s25, 0 }
  0x3a   : > { %p2756_p2 = scmp.eq.s32.totalorder (!%p2755_p6), %s2344_s22, 0 }
  0x3b   : > { %497 = sbr.rel (%p2755_p6) target bundleno = 2666 (0xa6a), region = 84 }
  0x42   : > { %2235 = dma.done.wait (%p2756_p2), [#allocation3], 2048   ;;  %p2757_p7 = pmov %p2756_p2 }
  0x43   : > { %p2758_p3 = pmov %p2756_p2 }
  0x44   : > { %2237 = vsyncadd (%p2757_p7), [#allocation3], 4294965248 }
  0x45   : > { %2239 = dma.done.wait (%p2758_p3), [#allocation5], 2048   ;;  %p2759_p8 = pmov %p2756_p2 }
  0x46   : > { %p555_p9 = scmp.lt.s32.totalorder %s2344_s22, 1  ;;  %v574_v0 = vlaneseq  ;;  %v2250_v1 = vmov 0.0   ;;  %s2760_s26 = sld [smem:[#allocation9_spill]]  ;;  %v622_v8 = vld [vmem:[%s2734_s4 + $0x8] sm:$0xff]  ;;  %v625_v9 = vld [vmem:[%s2734_s4 + $0x20] sm:$0xff]  ;;  %v624_v12 = vld [vmem:[%s2734_s4 + $0x18] sm:$0xff] }
  0x47   : > { %2241 = vsyncadd (%p2759_p8), [#allocation5], 4294965248  ;;  %750 = vmatprep.mubr.f32.mxu0 %v2250_v1  ;;  %v621_v10 = vld [vmem:[%s2734_s4] sm:$0xff]  ;;  %v1956_v11 = vpack.c.bf16 %v625_v9, %v622_v8  ;;  %v628_v13 = vld [vmem:[%s2734_s4 + $0x38] sm:$0xff]  ;;  %vm2251_vm1 = vmmov 0   ;;  %vm1022_vm2 = vcmask 64512  }
  0x48   : > { %s2764_s22 = smov (!%p555_p9, %s2344_s22), 1  ;;  %v575_v2 = vand.u32 127, %v574_v0  ;;  %v631_v14 = vld [vmem:[%s2734_s4 + $0x50] sm:$0xff]  ;;  %v1958_v15 = vpack.c.bf16 %v624_v12, %v621_v10  ;;  %v626_v18 = vld [vmem:[%s2734_s4 + $0x28] sm:$0xff]  ;;  %v637_v23 = vld [vmem:[%s2734_s4 + $0x80] sm:$0xff]  ;;  %s2761_s30 = sld [smem:[#allocation10_spill]] }
  0x49   : > { %s1714_s25 = sshll.u32 %s2764_s22, 4  ;;  %v1960_v16 = vpack.c.bf16 %v631_v14, %v628_v13  ;;  %v623_v17 = vld [vmem:[%s2734_s4 + $0x10] sm:$0xff]  ;;  %1957 = vmatprep.subr.bf16.mxu0 %v1956_v11  ;;  %v630_v21 = vld [vmem:[%s2734_s4 + $0x48] sm:$0xff]  ;;  %v629_v25 = vld [vmem:[%s2734_s4 + $0x40] sm:$0xff]  ;;  %s1697_s19 = sshll.u32 %s2764_s22, 1 }
  0x4a   : > { %vm576_vm0 = vcmp.lt.s32.totalorder %v575_v2, 32  ;;  %v627_v19 = vld [vmem:[%s2734_s4 + $0x30] sm:$0xff]  ;;  %v1988_v20 = vpack.c.bf16 %v626_v18, %v623_v17  ;;  %v634_v22 = vld [vmem:[%s2734_s4 + $0x68] sm:$0xff]  ;;  %1959 = vmatpush1.bf16.msra.mxu0 %v1958_v15  ;;  %v632_v26 = vld [vmem:[%s2734_s4 + $0x58] sm:$0xff]  ;;  %s563_s24 = scalar_lea.vmem %s2731_s1, %s1697_s19 }
  0x4b   : > { %v2433_v3 = vsel %vm576_vm0, 1.0, %v2250_v1  ;;  %v1962_v24 = vpack.c.bf16 %v630_v21, %v627_v19  ;;  %1961 = vmatprep.subr.bf16.mxu0 %v1960_v16  ;;  %v1964_v27 = vpack.c.bf16 %v637_v23, %v634_v22  ;;  %v1992_v28 = vpack.c.bf16 %v632_v26, %v629_v25  ;;  %v633_v29 = vld [vmem:[%s2734_s4 + $0x60] sm:$0xff]  ;;  %v636_v30 = vld [vmem:[%s2734_s4 + $0x78] sm:$0xff]  ;;  %v643_v43 = vld [vmem:[%s2734_s4 + $0xb0] sm:$0xff] }
  0x4c   : > { %s559_s29 = scalar_lea.vmem %s2760_s26, %s1714_s25  ;;  %1989 = vmatprep.subr.bf16.mxu1 %v1988_v20  ;;  %v1966_v31 = vpack.c.bf16 %v636_v30, %v633_v29  ;;  %v640_v42 = vld [vmem:[%s2734_s4 + $0x98] sm:$0xff]  ;;  %v635_v44 = vld [vmem:[%s2734_s4 + $0x70] sm:$0xff]  ;;  %v638_v46 = vld [vmem:[%s2734_s4 + $0x88] sm:$0xff] }
  0x4d   : > { %v569_v4 = vld [vmem:[%s559_s29] sm:$0xff]  ;;  %v570_v5 = vld [vmem:[%s559_s29 + $0x8] sm:$0xff]  ;;  %1991 = vmatpush3.bf16.msra.mxu1 %v1988_v20  ;;  %v1968_v45 = vpack.c.bf16 %v643_v43, %v640_v42  ;;  %v639_v47 = vld [vmem:[%s2734_s4 + $0x90] sm:$0xff]  ;;  %v1996_v49 = vpack.c.bf16 %v638_v46, %v635_v44 }
  0x4e   : > { %v579_v6 = vmul.f32 %v2433_v3, %v569_v4  ;;  %v580_v7 = vmul.f32 %v2433_v3, %v570_v5  ;;  %1993 = vmatprep.subr.bf16.mxu1 %v1992_v28  ;;  %1963 = vmatpush1.bf16.msra.mxu0 %v1962_v24  ;;  %v642_v48 = vld [vmem:[%s2734_s4 + $0xa8] sm:$0xff]  ;;  %v649_v52 = vld [vmem:[%s2734_s4 + $0xe0] sm:$0xff]  ;;  %v644_v55 = vld [vmem:[%s2734_s4 + $0xb8] sm:$0xff]  ;;  %s568_s0 = scalar_lea.vmem %s2761_s30, %s1714_s25 }
  0x4f   : > { %1965 = vmatprep.subr.bf16.mxu0 %v1964_v27  ;;  %v1970_v50 = vpack.c.bf16 %v642_v48, %v639_v47  ;;  %v646_v51 = vld [vmem:[%s2734_s4 + $0xc8] sm:$0xff]  ;;  %v641_v53 = vld [vmem:[%s2734_s4 + $0xa0] sm:$0xff]  ;;  %v648_v57 = vld [vmem:[%s2734_s4 + $0xd8] sm:$0xff] }
  0x50   : > { %581 = vadd.xlane.f32.xlu0 %v579_v6  ;;  %v1972_v54 = vpack.c.bf16 %v649_v52, %v646_v51  ;;  %v645_v56 = vld [vmem:[%s2734_s4 + $0xc0] sm:$0xff]  ;;  %v2000_v58 = vpack.c.bf16 %v644_v55, %v641_v53  ;;  %v652_v60 = vld [vmem:[%s2734_s4 + $0xf8] sm:$0xff]  ;;  %v655_v61 = vld [vmem:[%s2734_s4 + $0x110] sm:$0xff] }
  0x51   : > { %1995 = vmatpush3.bf16.msra.mxu1 %v1992_v28  ;;  %v1974_v59 = vpack.c.bf16 %v648_v57, %v645_v56  ;;  %v647_v62 = vld [vmem:[%s2734_s4 + $0xd0] sm:$0xff]  ;;  %v1976_v63 = vpack.c.bf16 %v655_v61, %v652_v60  ;;  %v650_v2 = vld [vmem:[%s2734_s4 + $0xe8] sm:$0xff]  ;;  %v661_v9 = vld [vmem:[%s2734_s4 + $0x140] sm:$0xff] }
  0x52   : > { %1967 = vmatpush1.bf16.msra.mxu0 %v1966_v31  ;;  %1997 = vmatprep.subr.bf16.mxu1 %v1996_v49  ;;  %v2004_v6 = vpack.c.bf16 %v650_v2, %v647_v62  ;;  %v658_v8 = vld [vmem:[%s2734_s4 + $0x128] sm:$0xff]  ;;  %v653_v10 = vld [vmem:[%s2734_s4 + $0x100] sm:$0xff]  ;;  %v656_v12 = vld [vmem:[%s2734_s4 + $0x118] sm:$0xff]  ;;  %v2252_v2 = vmov 1966171168  }
  0x53   : > { %1969 = vmatprep.subr.bf16.mxu0 %v1968_v45  ;;  %v1980_v11 = vpack.c.bf16 %v661_v9, %v658_v8  ;;  %v657_v13 = vld [vmem:[%s2734_s4 + $0x120] sm:$0xff]  ;;  %v660_v14 = vld [vmem:[%s2734_s4 + $0x138] sm:$0xff]  ;;  %v2008_v15 = vpack.c.bf16 %v656_v12, %v653_v10  ;;  %v667_v18 = vld [vmem:[%s2734_s4 + $0x170] sm:$0xff] }
  0x54   : > { %583 = vadd.xlane.f32.xlu0 %v580_v7  ;;  %v1982_v16 = vpack.c.bf16 %v660_v14, %v657_v13  ;;  %v664_v17 = vld [vmem:[%s2734_s4 + $0x158] sm:$0xff]  ;;  %v659_v19 = vld [vmem:[%s2734_s4 + $0x130] sm:$0xff]  ;;  %v662_v21 = vld [vmem:[%s2734_s4 + $0x148] sm:$0xff] }
  0x55   : > { %1999 = vmatpush3.bf16.msra.mxu1 %v1996_v49  ;;  %v1984_v20 = vpack.c.bf16 %v667_v18, %v664_v17  ;;  %v663_v22 = vld [vmem:[%s2734_s4 + $0x150] sm:$0xff]  ;;  %v666_v23 = vld [vmem:[%s2734_s4 + $0x168] sm:$0xff]  ;;  %v2012_v24 = vpack.c.bf16 %v662_v21, %v659_v19  ;;  %v665_v26 = vld [vmem:[%s2734_s4 + $0x160] sm:$0xff] }
  0x56   : > { %1971 = vmatpush1.bf16.msra.mxu0 %v1970_v50  ;;  %2001 = vmatprep.subr.bf16.mxu1 %v2000_v58  ;;  %v1986_v25 = vpack.c.bf16 %v666_v23, %v663_v22  ;;  %v668_v27 = vld [vmem:[%s2734_s4 + $0x178] sm:$0xff]  ;;  %v669_v47 = vld [vmem:[%s2735_s5] sm:$0x7] }
  0x57   : > { %1973 = vmatprep.subr.bf16.mxu0 %v1972_v54  ;;  %v2016_v28 = vpack.c.bf16 %v668_v27, %v665_v26 }
  0x59   : > { %2003 = vmatpush3.bf16.msra.mxu1 %v2000_v58 }
  0x5a   : > { %1975 = vmatpush1.bf16.msra.mxu0 %v1974_v59  ;;  %2005 = vmatprep.subr.bf16.mxu1 %v2004_v6 }
  0x5b   : > { %1977 = vmatprep.subr.bf16.mxu0 %v1976_v63 }
  0x5d   : > { %2007 = vmatpush3.bf16.msra.mxu1 %v2004_v6  ;;  %v571_v6 = vld [vmem:[%s563_s24] sm:$0x3] }
  0x5e   : > { %2009 = vmatprep.subr.bf16.mxu1 %v2008_v15 }
  0x61   : > { %2011 = vmatpush3.bf16.msra.mxu1 %v2008_v15 }
  0x62   : > { %2013 = vmatprep.subr.bf16.mxu1 %v2012_v24 }
  0x65   : > { %2015 = vmatpush3.bf16.msra.mxu1 %v2012_v24 }
  0x66   : > { %2017 = vmatprep.subr.bf16.mxu1 %v2016_v28 }
  0x69   : > { %2019 = vmatpush3.bf16.msra.mxu1 %v2016_v28 }
  0xdd   : > { %v582_v32 = vpop.xlane.xlu0 %581 }
  0xde   : > { %v585_v33 = vmul.f32 0.03125, %v582_v32 }
  0xe0   : > { %v2485_v34 = vsub.f32 %v569_v4, %v585_v33  ;;  %v651_v4 = vld [vmem:[%s2734_s4 + $0xf0] sm:$0xff] }
  0xe1   : > { %v584_v35 = vpop.xlane.xlu0 %583 }
  0xe2   : > { %v586_v36 = vmul.f32 0.03125, %v584_v35  ;;  %v589_v37 = vmul.f32 %v2433_v3, %v2485_v34 }
  0xe4   : > { %v2489_v38 = vsub.f32 %v570_v5, %v586_v36  ;;  %v591_v39 = vmul.f32 %v589_v37, %v589_v37  ;;  %v654_v5 = vld [vmem:[%s2734_s4 + $0x108] sm:$0xff]  ;;  %v1701_v37 = vld [vmem:[%s2732_s2] ss:$0 sm:$0xff] }
  0xe5   : > { %v1978_v7 = vpack.c.bf16 %v654_v5, %v651_v4  ;;  %v983_v4 = vunpack.c.l.s4 %v2252_v2 }
  0xe6   : > { %593 = vadd.xlane.f32.xlu1 %v591_v39  ;;  %v590_v40 = vmul.f32 %v2433_v3, %v2489_v38 }
  0xe7   : > { %1979 = vmatpush1.bf16.msra.mxu0 %v1978_v7  ;;  %v984_v5 = vunpack.c.0.s8 %v983_v4  ;;  %v980_v7 = vsub.f32 1.0, %v571_v6  ;;  %v1206_v6 = vld [vmem:[%s2736_s6 + $0x78] sm:$0xff] }
  0xe8   : > { %v592_v41 = vmul.f32 %v590_v40, %v590_v40  ;;  %1981 = vmatprep.subr.bf16.mxu0 %v1980_v11  ;;  %v1702_v40 = vld [vmem:[%s2733_s3] ss:$0 sm:$0xff] }
  0xea   : > { %595 = vadd.xlane.f32.xlu1 %v592_v41 }
  0xeb   : > { %1983 = vmatpush1.bf16.msra.mxu0 %v1982_v16 }
  0xec   : > { %1985 = vmatprep.subr.bf16.mxu0 %v1984_v20 }
  0xef   : > { %1987 = vmatpush1.bf16.msra.mxu0 %v1986_v25 }
  0xf0   : > { %1831 = vmatprep.subr.mxu0 %v2250_v1 }
 0x173   : > { %v594_v29 = vpop.xlane.xlu1 %593 }
 0x174   : > { %v597_v30 = vmul.f32 0.03125, %v594_v29 }
 0x176   : > { %v599_v31 = vadd.f32 1e-12, %v597_v30 }
 0x177   : > { %v596_v32 = vpop.xlane.xlu1 %595 }
 0x178   : > { %2150 = vrsqrt.f32 %v599_v31  ;;  %v598_v33 = vmul.f32 0.03125, %v596_v32 }
 0x17a   : > { %v600_v35 = vadd.f32 1e-12, %v598_v33 }
 0x17c   : > { %2152 = vrsqrt.f32 %v600_v35 }
 0x182   : > { %v2151_v36 = vpop.eup %2150 }
 0x183   : > { %v603_v39 = vmul.f32 %v2151_v36, %v2485_v34  ;;  %v672_v34 = vshrl.u32 %v574_v0, 7 }
 0x185   : > { %v611_v41 = vmul.f32 %v1701_v37, %v603_v39  ;;  %v673_v48 = vsub.s32 0, %v672_v34  ;;  %v681_v49 = vsub.s32 2, %v672_v34  ;;  %v987_v8 = vsub.s32 %v984_v5, %v672_v34  ;;  %v1191_v39 = vld [vmem:[%s2736_s6] sm:$0xff]  ;;  %v1205_v5 = vld [vmem:[%s2736_s6 + $0x70] sm:$0xff] }
 0x186   : > { %v2153_v42 = vpop.eup %2152 }
 0x187   : > { %v2597_v43 = vadd.f32 %v1702_v40, %v611_v41  ;;  %v604_v44 = vmul.f32 %v2153_v42, %v2489_v38  ;;  %v677_v38 = vsub.s32 1, %v672_v34  ;;  %v674_v52 = vrot.slane %v669_v47, %v673_v48  ;;  %v1193_v41 = vld [vmem:[%s2736_s6 + $0x10] sm:$0xff]  ;;  %v1195_v34 = vld [vmem:[%s2736_s6 + $0x20] sm:$0xff] }
 0x188   : > { %v682_v54 = vrot.slane %v669_v47, %v681_v49  ;;  %v988_v9 = vrot.slane %v980_v7, %v987_v8  ;;  %v1198_v49 = vld [vmem:[%s2736_s6 + $0x38] sm:$0xff]  ;;  %v2048_v7 = vpack.c.bf16 %v1206_v6, %v1205_v5 }
 0x189   : > { %751 = vmatmul.mubr.f32.vlgmr.msra.gmra.mrb[0].mxu0 %v2597_v43  ;;  %1828 = vmatprep.mubr.f32.mxu1 %v2597_v43  ;;  %v612_v45 = vmul.f32 %v1701_v37, %v604_v44  ;;  %v678_v50 = vrot.slane %v669_v47, %v677_v38  ;;  %v1194_v44 = vld [vmem:[%s2736_s6 + $0x18] sm:$0xff]  ;;  %v1196_v38 = vld [vmem:[%s2736_s6 + $0x28] sm:$0xff] }
 0x18a   : > { %756 = vmatprep.mubr.f32.mxu0 %v2250_v1  ;;  %v996_v10 = vrot.slane %v988_v9, %v987_v8  ;;  %v989_v11 = vcombine.high %v988_v9, %v988_v9  ;;  %v2028_v47 = vpack.c.bf16 %v1196_v38, %v1195_v34  ;;  %v1346_v34 = vld [vmem:[#allocation2 + $0x58] sm:$0xff] }
 0x18b   : > { %v2603_v46 = vadd.f32 %v1702_v40, %v612_v45  ;;  %v1192_v40 = vld [vmem:[%s2736_s6 + $0x8] sm:$0xff]  ;;  %v2024_v45 = vpack.c.bf16 %v1194_v44, %v1193_v41  ;;  %v1343_v41 = vld [vmem:[#allocation2 + $0x40] sm:$0xff]  ;;  %v1345_v44 = vld [vmem:[#allocation2 + $0x50] sm:$0xff] }
 0x18c   : > { %v1006_v12 = vmul.f32 -1e+09, %v996_v10  ;;  %v1003_v13 = vrot.slane %v989_v11, %v987_v8  ;;  %v2020_v42 = vpack.c.bf16 %v1192_v40, %v1191_v39  ;;  %v1342_v39 = vld [vmem:[#allocation2 + $0x38] sm:$0xff]  ;;  %v2072_v38 = vpack.c.bf16 %v1346_v34, %v1345_v44 }
 0x18d   : > { %757 = vmatmul.mubr.f32.gmra.mrb[2].mxu0 %v2603_v46  ;;  %1829 = vmatmul.mubr.f32.vlgmr.msra.gmra.mrb[0].mxu1 %v2603_v46 }
 0x18e   : > { %1833 = vmatprep.mubr.msk.f32.mxu0 %vm2251_vm1, %v2250_v1  ;;  %v1013_v14 = vrot.slane %v1006_v12, %v673_v48  ;;  %v1007_v15 = vmul.f32 -1e+09, %v1003_v13  ;;  %2021 = vmatprep.subr.bf16.mxu1 %v2020_v42 }
 0x18f   : > { %2023 = vmatpush3.bf16.msra.mxu1 %v2020_v42  ;;  %v1344_v42 = vld [vmem:[#allocation2 + $0x48] sm:$0xff] }
 0x190   : > { %v1017_v20 = vrot.slane %v1007_v15, %v673_v48  ;;  %2025 = vmatprep.subr.bf16.mxu1 %v2024_v45  ;;  %v1197_v48 = vld [vmem:[%s2736_s6 + $0x30] sm:$0xff] }
 0x193   : > { %2027 = vmatpush3.bf16.msra.mxu1 %v2024_v45  ;;  %v2068_v45 = vpack.c.bf16 %v1344_v42, %v1343_v41 }
 0x194   : > { %2029 = vmatprep.subr.bf16.mxu1 %v2028_v47 }
 0x197   : > { %2031 = vmatpush3.bf16.msra.mxu1 %v2028_v47  ;;  %v1347_v47 = vld [vmem:[#allocation2 + $0x60] sm:$0xff] }
 0x25c   : > { %v752_v51 = vpop.f32.mrb[0].mxu0 }
 0x25d   : > { %v754_v53 = vpop.f32.mrb[1].mxu0  ;;  %v753_v58 = vadd.f32 %v752_v51, %v674_v52  ;;  %v1199_v51 = vld [vmem:[%s2736_s6 + $0x40] sm:$0xff] }
 0x25e   : > { %v755_v55 = vadd.f32 %v754_v53, %v678_v50 }
 0x260   : > { %v758_v56 = vpop.f32.mrb[2].mxu0  ;;  %v1830_v57 = vpop.f32.mrb[0].mxu1  ;;  %1832 = vmatpush3.xpose.msra.mxu0 %v755_v55  ;;  %v1202_v55 = vld [vmem:[%s2736_s6 + $0x58] sm:$0xff] }
 0x261   : > { %v2613_v59 = vadd.f32 %v1830_v57, %v682_v54  ;;  %v760_v0 = vpop.f32.mrb[3].mxu0  ;;  %v829_v60 = vpop.f32.mrb[1].mxu1  ;;  %1836 = vmatprep.subr.mxu0 %v2250_v1  ;;  %v759_v62 = vadd.f32 %v758_v56, %v674_v52  ;;  %v1200_v52 = vld [vmem:[%s2736_s6 + $0x48] sm:$0xff]  ;;  %v1203_v57 = vld [vmem:[%s2736_s6 + $0x60] sm:$0xff] }
 0x262   : > { %v761_v61 = vadd.f32 %v760_v0, %v678_v50  ;;  %v830_v63 = vadd.f32 %v829_v60, %v682_v54  ;;  %v2032_v50 = vpack.c.bf16 %v1198_v49, %v1197_v48  ;;  %v2036_v53 = vpack.c.bf16 %v1200_v52, %v1199_v51  ;;  %v1201_v54 = vld [vmem:[%s2736_s6 + $0x50] sm:$0xff]  ;;  %v1348_v48 = vld [vmem:[#allocation2 + $0x68] sm:$0xff]  ;;  %v1350_v51 = vld [vmem:[#allocation2 + $0x78] sm:$0xff] }
 0x263   : > { %1834 = vmatmul.mubr.f32.vlgmr.msra.gmra.mrb[4].mxu0 %v753_v58  ;;  %v2040_v56 = vpack.c.bf16 %v1202_v55, %v1201_v54  ;;  %v1204_v58 = vld [vmem:[%s2736_s6 + $0x68] sm:$0xff]  ;;  %v2076_v49 = vpack.c.bf16 %v1348_v48, %v1347_v47 }
 0x264   : > { %1837 = vmatpush3.xpose.msra.mxu0 %v761_v61  ;;  %1838 = vmatprep.mubr.msk.f32.mxu0 %vm2251_vm1, %v2250_v1  ;;  %v2044_v0 = vpack.c.bf16 %v1204_v58, %v1203_v57 }
 0x265   : > { %1841 = vmatprep.subr.mxu0 %v2250_v1  ;;  %2033 = vmatprep.subr.bf16.mxu1 %v2032_v50 }
 0x266   : > { %2035 = vmatpush3.bf16.msra.mxu1 %v2032_v50  ;;  %v1349_v50 = vld [vmem:[#allocation2 + $0x70] sm:$0xff] }
 0x267   : > { %1839 = vmatmul.mubr.f32.vlgmr.msra.gmra.mrb[6].mxu0 %v759_v62  ;;  %2037 = vmatprep.subr.bf16.mxu1 %v2036_v53  ;;  %v2080_v52 = vpack.c.bf16 %v1350_v51, %v1349_v50 }
 0x268   : > { %1842 = vmatpush3.msra.mxu0 %v830_v63  ;;  %1843 = vmatprep.mubr.msk.f32.mxu0 %vm2251_vm1, %v2250_v1 }
 0x269   : > { %1846 = vmatprep.subr.mxu0 %v2250_v1 }
 0x26a   : > { %2039 = vmatpush3.bf16.msra.mxu1 %v2036_v53 }
 0x26b   : > { %2041 = vmatprep.subr.bf16.mxu1 %v2040_v56 }
 0x26e   : > { %2043 = vmatpush3.bf16.msra.mxu1 %v2040_v56 }
 0x26f   : > { %2045 = vmatprep.subr.bf16.mxu1 %v2044_v0 }
 0x272   : > { %2047 = vmatpush3.bf16.msra.mxu1 %v2044_v0 }
 0x273   : > { %2049 = vmatprep.subr.bf16.mxu1 %v2048_v7 }
 0x276   : > { %2051 = vmatpush3.bf16.msra.mxu1 %v2048_v7 }
 0x336   : > { %v904_v16 = vpop.f32.mrb[4].mxu0 }
 0x337   : > { %v978_v17 = vmul.f32 0.17677669, %v904_v16  ;;  %v1835_v18 = vpop.f32.mrb[5].mxu0 }
 0x339   : > { %v1020_v19 = vadd.f32 %v1013_v14, %v978_v17 }
 0x33a   : > { %v974_v21 = vpop.f32.mrb[6].mxu0 }
 0x33b   : > { %v979_v22 = vmul.f32 0.17677669, %v974_v21  ;;  %v1840_v23 = vpop.f32.mrb[7].mxu0  ;;  %v1023_v24 = vsel %vm1022_vm2, %v1020_v19, -inf  ;;  %v1337_v21 = vld [vmem:[#allocation2 + $0x10] sm:$0xff] }
 0x33c   : > { %1024 = vmax.xlane.f32.xlu0 %v1023_v24  ;;  %v1338_v23 = vld [vmem:[#allocation2 + $0x18] sm:$0xff] }
 0x33d   : > { %v1021_v25 = vadd.f32 %v1017_v20, %v979_v22  ;;  %v1336_v20 = vld [vmem:[#allocation2 + $0x8] sm:$0xff]  ;;  %v2056_v24 = vpack.c.bf16 %v1338_v23, %v1337_v21 }
 0x33f   : > { %v1026_v26 = vsel %vm1022_vm2, %v1021_v25, -inf }
 0x340   : > { %1027 = vmax.xlane.f32.xlu1 %v1026_v26  ;;  %v1340_v26 = vld [vmem:[#allocation2 + $0x28] sm:$0xff] }
 0x3c9   : > { %v1025_v27 = vpop.xlane.xlu0 %1024 }
 0x3ca   : > { %v1029_v28 = vsub.f32 %v1020_v19, %v1025_v27  ;;  %v1335_v19 = vld [vmem:[#allocation2] sm:$0xff] }
 0x3cb   : > { %v2052_v22 = vpack.c.bf16 %v1336_v20, %v1335_v19  ;;  %v1460_v19 = vld [vmem:[#allocation4 + $0x48] sm:$0xff]  ;;  %v1461_v20 = vld [vmem:[#allocation4 + $0x50] sm:$0xff] }
 0x3cc   : > { %v1031_v29 = vmul.f32 1.442695, %v1029_v28 }
 0x3cd   : > { %v1028_v30 = vpop.xlane.xlu1 %1027 }
 0x3ce   : > { %2154 = vpow2.f32 %v1031_v29  ;;  %v1030_v31 = vsub.f32 %v1021_v25, %v1028_v30  ;;  %v1339_v25 = vld [vmem:[#allocation2 + $0x20] sm:$0xff] }
 0x3d0   : > { %v1033_v32 = vmul.f32 1.442695, %v1030_v31 }
 0x3d2   : > { %2156 = vpow2.f32 %v1033_v32 }
 0x3d8   : > { %v2155_v33 = vpop.eup %2154 }
 0x3d9   : > { %v1035_v35 = vsel %vm1022_vm2, %v2155_v33, 0.0 }
 0x3da   : > { %1036 = vadd.xlane.f32.xlu0 %v1035_v35 }
 0x3dc   : > { %v2157_v36 = vpop.eup %2156 }
 0x3dd   : > { %v1038_v37 = vsel %vm1022_vm2, %v2157_v36, 0.0 }
 0x3de   : > { %1039 = vadd.xlane.f32.xlu1 %v1038_v37  ;;  %v1341_v37 = vld [vmem:[#allocation2 + $0x30] sm:$0xff] }
 0x3df   : > { %v2064_v40 = vpack.c.bf16 %v1342_v39, %v1341_v37 }
 0x467   : > { %v1037_v60 = vpop.xlane.xlu0 %1036 }
 0x468   : > { %2158 = vrcp.f32 %v1037_v60  ;;  %v1706_v60 = vld [vmem:[%s2738_s8] ss:$0 sm:$0xff] }
 0x46b   : > { %v1040_v61 = vpop.xlane.xlu1 %1039 }
 0x46c   : > { %2160 = vrcp.f32 %v1040_v61 }
 0x472   : > { %v2159_v62 = vpop.eup %2158 }
 0x473   : > { %v1042_v63 = vmul.f32 %v2159_v62, %v2155_v33 }
 0x475   : > { %1844 = vmatmul.mubr.msk.f32.vlgmr.msra.gmra.mrb[8].mxu0 %vm1022_vm2, %v1042_v63 }
 0x476   : > { %v2161_v2 = vpop.eup %2160  ;;  %1847 = vmatpush3.msra.mxu0 %v2613_v59  ;;  %1848 = vmatprep.mubr.msk.f32.mxu0 %vm2251_vm1, %v2250_v1  ;;  %v1705_v1 = vld [vmem:[%s2737_s7] ss:$0 sm:$0xff] }
 0x477   : > { %v1044_v4 = vmul.f32 %v2161_v2, %v2157_v36  ;;  %2053 = vmatprep.subr.bf16.mxu0 %v2052_v22  ;;  %v1707_v2 = vld [vmem:[%s2739_s9] ss:$0 sm:$0xff] }
 0x479   : > { %1849 = vmatmul.mubr.msk.f32.vlgmr.msra.gmra.mrb[10].mxu0 %vm1022_vm2, %v1044_v4 }
 0x47a   : > { %2055 = vmatpush3.bf16.msra.mxu0 %v2052_v22  ;;  %v1462_v22 = vld [vmem:[#allocation4 + $0x58] sm:$0xff] }
 0x47b   : > { %2057 = vmatprep.subr.bf16.mxu0 %v2056_v24  ;;  %v2104_v23 = vpack.c.bf16 %v1462_v22, %v1461_v20 }
 0x47e   : > { %2059 = vmatpush3.bf16.msra.mxu0 %v2056_v24  ;;  %v1463_v24 = vld [vmem:[#allocation4 + $0x60] sm:$0xff] }
 0x548   : > { %v1114_v8 = vpop.f32.mrb[8].mxu0 }
 0x549   : > { %v1845_v9 = vpop.f32.mrb[9].mxu0  ;;  %1883 = vmatprep.mubr.f32.mxu1 %v1114_v8  ;;  %v1451_v8 = vld [vmem:[#allocation4] sm:$0xff] }
 0x54a   : > { %v1452_v9 = vld [vmem:[#allocation4 + $0x8] sm:$0xff] }
 0x54c   : > { %v1187_v59 = vpop.f32.mrb[10].mxu0 }
 0x54d   : > { %v1850_v10 = vpop.f32.mrb[11].mxu0  ;;  %1884 = vmatmul.mubr.f32.vlgmr.msra.gmra.mrb[2].mxu1 %v1187_v59  ;;  %v2084_v59 = vpack.c.bf16 %v1452_v9, %v1451_v8 }
 0x54e   : > { %v1453_v10 = vld [vmem:[#allocation4 + $0x10] sm:$0xff] }
 0x54f   : > { %2085 = vmatprep.subr.bf16.mxu1 %v2084_v59 }
 0x550   : > { %2087 = vmatpush3.bf16.msra.mxu1 %v2084_v59 }
 0x620   : > { %v1885_v11 = vpop.f32.mrb[2].mxu1 }
 0x621   : > { %v1286_v12 = vadd.f32 %v1885_v11, %v1705_v1  ;;  %v1280_v13 = vpop.f32.mrb[3].mxu1 }
 0x622   : > { %v1281_v14 = vadd.f32 %v1705_v1, %v1280_v13  ;;  %v1454_v1 = vld [vmem:[#allocation4 + $0x18] sm:$0xff]  ;;  %v1456_v13 = vld [vmem:[#allocation4 + $0x28] sm:$0xff] }
 0x623   : > { %v1290_v15 = vadd.f32 %v1286_v12, %v2603_v46  ;;  %v2060_v46 = vpack.c.bf16 %v1340_v26, %v1339_v25  ;;  %v2088_v11 = vpack.c.bf16 %v1454_v1, %v1453_v10  ;;  %v1455_v12 = vld [vmem:[#allocation4 + $0x20] sm:$0xff]  ;;  %v1464_v25 = vld [vmem:[#allocation4 + $0x68] sm:$0xff] }
 0x624   : > { %v1289_v16 = vadd.f32 %v1281_v14, %v2597_v43  ;;  %v2092_v14 = vpack.c.bf16 %v1456_v13, %v1455_v12  ;;  %v2108_v26 = vpack.c.bf16 %v1464_v25, %v1463_v24 }
 0x625   : > { %v1294_v17 = vmul.f32 %v2433_v3, %v1290_v15  ;;  %2061 = vmatprep.subr.bf16.mxu0 %v2060_v46  ;;  %2089 = vmatprep.subr.bf16.mxu1 %v2088_v11 }
 0x626   : > { %v1293_v18 = vmul.f32 %v2433_v3, %v1289_v16  ;;  %2063 = vmatpush3.bf16.msra.mxu0 %v2060_v46  ;;  %2091 = vmatpush3.bf16.msra.mxu1 %v2088_v11  ;;  %v1465_v46 = vld [vmem:[#allocation4 + $0x70] sm:$0xff] }
 0x627   : > { %1297 = vadd.xlane.f32.xlu1 %v1294_v17  ;;  %2065 = vmatprep.subr.bf16.mxu0 %v2064_v40 }
 0x628   : > { %1295 = vadd.xlane.f32.xlu0 %v1293_v18  ;;  %2093 = vmatprep.subr.bf16.mxu1 %v2092_v14  ;;  %v1459_v18 = vld [vmem:[#allocation4 + $0x40] sm:$0xff] }
 0x629   : > { %v2100_v21 = vpack.c.bf16 %v1460_v19, %v1459_v18  ;;  %v1711_v18 = vld [vmem:[%s2745_s15] ss:$0 sm:$0xff] }
 0x62a   : > { %2067 = vmatpush3.bf16.msra.mxu0 %v2064_v40  ;;  %2095 = vmatpush3.bf16.msra.mxu1 %v2092_v14 }
 0x62b   : > { %2069 = vmatprep.subr.bf16.mxu0 %v2068_v45 }
 0x62e   : > { %2071 = vmatpush3.bf16.msra.mxu0 %v2068_v45 }
 0x62f   : > { %2073 = vmatprep.subr.bf16.mxu0 %v2072_v38 }
 0x632   : > { %2075 = vmatpush3.bf16.msra.mxu0 %v2072_v38 }
 0x633   : > { %2077 = vmatprep.subr.bf16.mxu0 %v2076_v49 }
 0x636   : > { %2079 = vmatpush3.bf16.msra.mxu0 %v2076_v49 }
 0x637   : > { %2081 = vmatprep.subr.bf16.mxu0 %v2080_v52 }
 0x63a   : > { %2083 = vmatpush3.bf16.msra.mxu0 %v2080_v52 }
 0x6b4   : > { %v1298_v43 = vpop.xlane.xlu1 %1297 }
 0x6b5   : > { %v1300_v27 = vmul.f32 0.03125, %v1298_v43  ;;  %v1296_v28 = vpop.xlane.xlu0 %1295  ;;  %v1466_v43 = vld [vmem:[#allocation4 + $0x78] sm:$0xff] }
 0x6b6   : > { %v1299_v29 = vmul.f32 0.03125, %v1296_v28  ;;  %v1708_v28 = vld [vmem:[%s2741_s11] ss:$0 sm:$0xff] }
 0x6b7   : > { %v1302_v30 = vsub.f32 %v1290_v15, %v1300_v27  ;;  %v1457_v15 = vld [vmem:[#allocation4 + $0x30] sm:$0xff]  ;;  %v2112_v27 = vpack.c.bf16 %v1466_v43, %v1465_v46 }
 0x6b8   : > { %v1301_v31 = vsub.f32 %v1289_v16, %v1299_v29  ;;  %v1458_v16 = vld [vmem:[#allocation4 + $0x38] sm:$0xff] }
 0x6b9   : > { %v1304_v32 = vmul.f32 %v2433_v3, %v1302_v30  ;;  %v2096_v17 = vpack.c.bf16 %v1458_v16, %v1457_v15  ;;  %v1710_v16 = vld [vmem:[%s2744_s14] ss:$0 sm:$0xff] }
 0x6ba   : > { %v1303_v33 = vmul.f32 %v2433_v3, %v1301_v31 }
 0x6bb   : > { %v1306_v35 = vmul.f32 %v1304_v32, %v1304_v32  ;;  %2097 = vmatprep.subr.bf16.mxu1 %v2096_v17 }
 0x6bc   : > { %v1305_v36 = vmul.f32 %v1303_v33, %v1303_v33  ;;  %2099 = vmatpush3.bf16.msra.mxu1 %v2096_v17 }
 0x6bd   : > { %1309 = vadd.xlane.f32.xlu1 %v1306_v35  ;;  %2101 = vmatprep.subr.bf16.mxu1 %v2100_v21 }
 0x6be   : > { %1307 = vadd.xlane.f32.xlu0 %v1305_v36 }
 0x6c0   : > { %2103 = vmatpush3.bf16.msra.mxu1 %v2100_v21 }
 0x6c1   : > { %2105 = vmatprep.subr.bf16.mxu1 %v2104_v23 }
 0x6c4   : > { %2107 = vmatpush3.bf16.msra.mxu1 %v2104_v23 }
 0x6c5   : > { %2109 = vmatprep.subr.bf16.mxu1 %v2108_v26 }
 0x6c8   : > { %2111 = vmatpush3.bf16.msra.mxu1 %v2108_v26 }
 0x6c9   : > { %2113 = vmatprep.subr.bf16.mxu1 %v2112_v27 }
 0x6cc   : > { %2115 = vmatpush3.bf16.msra.mxu1 %v2112_v27 }
 0x74a   : > { %v1310_v53 = vpop.xlane.xlu1 %1309 }
 0x74b   : > { %v1312_v54 = vmul.f32 0.03125, %v1310_v53  ;;  %v1308_v55 = vpop.xlane.xlu0 %1307  ;;  %v1709_v53 = vld [vmem:[%s2743_s13] ss:$0 sm:$0xff] }
 0x74c   : > { %v1311_v56 = vmul.f32 0.03125, %v1308_v55 }
 0x74d   : > { %v1314_v57 = vadd.f32 1e-12, %v1312_v54 }
 0x74e   : > { %v1313_v58 = vadd.f32 1e-12, %v1311_v56 }
 0x74f   : > { %2162 = vrsqrt.f32 %v1314_v57 }
 0x750   : > { %2164 = vrsqrt.f32 %v1313_v58 }
 0x759   : > { %v2163_v0 = vpop.eup %2162 }
 0x75a   : > { %v2165_v61 = vpop.eup %2164  ;;  %v1318_v62 = vmul.f32 %v2163_v0, %v1302_v30 }
 0x75b   : > { %v1317_v63 = vmul.f32 %v2165_v61, %v1301_v31 }
 0x75c   : > { %v1326_v4 = vmul.f32 %v1706_v60, %v1318_v62 }
 0x75d   : > { %v1325_v5 = vmul.f32 %v1706_v60, %v1317_v63 }
 0x75e   : > { %v2700_v7 = vadd.f32 %v1707_v2, %v1326_v4 }
 0x75f   : > { %v2698_v6 = vadd.f32 %v1707_v2, %v1325_v5 }
 0x761   : > { %1918 = vmatprep.mubr.f32.mxu0 %v2698_v6 }
 0x762   : > { %1919 = vmatmul.mubr.f32.vlgmr.msra.gmra.mrb[12].mxu0 %v2700_v7 }
 0x835   : > { %v1920_v29 = vpop.f32.mrb[12].mxu0 }
 0x836   : > { %v1430_v30 = vadd.f32 %v1920_v29, %v1708_v28  ;;  %v1424_v31 = vpop.f32.mrb[13].mxu0 }
 0x837   : > { %v1425_v32 = vadd.f32 %v1708_v28, %v1424_v31 }
 0x838   : > { %v1434_v33 = vmul.f32 %v1430_v30, %v1430_v30 }
 0x839   : > { %v1433_v35 = vmul.f32 %v1425_v32, %v1425_v32 }
 0x83a   : > { %v1436_v36 = vmul.f32 %v1434_v33, %v1430_v30 }
 0x83b   : > { %v1435_v37 = vmul.f32 %v1433_v35, %v1425_v32 }
 0x83c   : > { %v1438_v39 = vmul.f32 0.044715, %v1436_v36 }
 0x83d   : > { %v1437_v40 = vmul.f32 0.044715, %v1435_v37 }
 0x83e   : > { %v1440_v41 = vadd.f32 %v1438_v39, %v1430_v30 }
 0x83f   : > { %v1439_v42 = vadd.f32 %v1437_v40, %v1425_v32 }
 0x840   : > { %v1442_v44 = vmul.f32 0.7978846, %v1440_v41 }
 0x841   : > { %v1441_v45 = vmul.f32 0.7978846, %v1439_v42 }
 0x842   : > { %2166 = vtanh.f32 %v1442_v44 }
 0x843   : > { %2168 = vtanh.f32 %v1441_v45 }
 0x84c   : > { %v2167_v34 = vpop.eup %2166 }
 0x84d   : > { %v2169_v38 = vpop.eup %2168  ;;  %v1446_v47 = vadd.f32 1.0, %v2167_v34 }
 0x84e   : > { %v1445_v48 = vadd.f32 1.0, %v2169_v38 }
 0x84f   : > { %v1448_v49 = vmul.f32 0.5, %v1446_v47 }
 0x850   : > { %v1447_v50 = vmul.f32 0.5, %v1445_v48 }
 0x851   : > { %v1450_v52 = vmul.f32 %v1448_v49, %v1430_v30 }
 0x852   : > { %v1449_v51 = vmul.f32 %v1447_v50, %v1425_v32 }
 0x854   : > { %1953 = vmatprep.mubr.f32.mxu1 %v1449_v51 }
 0x855   : > { %1954 = vmatmul.mubr.f32.vlgmr.msra.gmra.mrb[4].mxu1 %v1450_v52 }
 0x928   : > { %v1955_v54 = vpop.f32.mrb[4].mxu1 }
 0x929   : > { %v1546_v55 = vadd.f32 %v1955_v54, %v1709_v53  ;;  %v1540_v56 = vpop.f32.mrb[5].mxu1 }
 0x92a   : > { %v1541_v57 = vadd.f32 %v1709_v53, %v1540_v56 }
 0x92b   : > { %v1550_v58 = vadd.f32 %v1546_v55, %v2700_v7 }
 0x92c   : > { %v1549_v0 = vadd.f32 %v1541_v57, %v2698_v6 }
 0x92d   : > { %v1554_v60 = vmul.f32 %v2433_v3, %v1550_v58 }
 0x92e   : > { %v1553_v61 = vmul.f32 %v2433_v3, %v1549_v0 }
 0x92f   : > { %1557 = vadd.xlane.f32.xlu1 %v1554_v60 }
 0x930   : > { %1555 = vadd.xlane.f32.xlu0 %v1553_v61 }
 0x9bc   : > { %v1558_v62 = vpop.xlane.xlu1 %1557 }
 0x9bd   : > { %v1560_v63 = vmul.f32 0.03125, %v1558_v62  ;;  %v1556_v2 = vpop.xlane.xlu0 %1555 }
 0x9be   : > { %v1559_v4 = vmul.f32 0.03125, %v1556_v2 }
 0x9bf   : > { %v1562_v5 = vsub.f32 %v1550_v58, %v1560_v63 }
 0x9c0   : > { %v1561_v8 = vsub.f32 %v1549_v0, %v1559_v4 }
 0x9c1   : > { %v1564_v9 = vmul.f32 %v2433_v3, %v1562_v5 }
 0x9c2   : > { %v1563_v59 = vmul.f32 %v2433_v3, %v1561_v8 }
 0x9c3   : > { %v1566_v10 = vmul.f32 %v1564_v9, %v1564_v9 }
 0x9c4   : > { %v1565_v7 = vmul.f32 %v1563_v59, %v1563_v59 }
 0x9c5   : > { %1569 = vadd.xlane.f32.xlu1 %v1566_v10 }
 0x9c6   : > { %1567 = vadd.xlane.f32.xlu0 %v1565_v7 }
 0xa52   : > { %v1570_v6 = vpop.xlane.xlu1 %1569 }
 0xa53   : > { %v1572_v1 = vmul.f32 0.03125, %v1570_v6  ;;  %v1568_v11 = vpop.xlane.xlu0 %1567 }
 0xa54   : > { %v1571_v12 = vmul.f32 0.03125, %v1568_v11 }
 0xa55   : > { %v1574_v13 = vadd.f32 1e-12, %v1572_v1 }
 0xa56   : > { %v1573_v14 = vadd.f32 1e-12, %v1571_v12 }
 0xa57   : > { %2170 = vrsqrt.f32 %v1574_v13 }
 0xa58   : > { %2172 = vrsqrt.f32 %v1573_v14 }
 0xa61   : > { %v2171_v15 = vpop.eup %2170 }
 0xa62   : > { %v2173_v17 = vpop.eup %2172  ;;  %v1578_v3 = vmul.f32 %v2171_v15, %v1562_v5 }
 0xa63   : > { %v1577_v19 = vmul.f32 %v2173_v17, %v1561_v8 }
 0xa64   : > { %v1586_v20 = vmul.f32 %v1710_v16, %v1578_v3 }
 0xa65   : > { %v1585_v21 = vmul.f32 %v1710_v16, %v1577_v19 }
 0xa66   : > { %v1594_v22 = vadd.f32 %v1711_v18, %v1586_v20 }
 0xa67   : > { %v1593_v23 = vadd.f32 %v1711_v18, %v1585_v21 }
 0xa68   : > { %1596 = vst [vmem:[%s568_s0 + $0x8] sm:$0xff] %v1594_v22 }
 0xa69   : > { %1595 = vst [vmem:[%s568_s0] sm:$0xff] %v1593_v23 }
 0xa6a PF: > { %s2762_s17 = sld [smem:[#allocation8_spill]] }
 0xa70   : > { %s28_s21 = sadd.s32 1, %s2762_s17  }
 0xa71   : > { %p25_p5 = scmp.ge.s32.totalorder %s28_s21, 4  }
 0xa73   :  { %27 = sbr.rel (!%p25_p5) target bundleno = 5 (0x5), region = 126 }
 0xa7a   :  { %1618 = vsyncpa [#allocation3], 1 }
 0xa7b   :  { %1620 = vsyncpa [#allocation3 + $0x1], 1 }
 0xa7c   :  { %1621 = vsyncpa [#allocation5], 1 }

</bundles_post_ra>
